<compile_context>
chip_gen: v7x
topology: tpu7x:2x2x1
jax: 0.10.0
libtpu: 0.0.40
codegen_flags: <defaults>
</compile_context>

<pallas_src>
import functools

import jax
import jax.numpy as jnp
from jax import lax
from jax.experimental import pallas as pl
from jax.experimental.pallas import tpu as pltpu

EPS = 1e-5       # nn.BatchNorm2d default eps
MARGIN = 128     # lane-aligned halo margin on the flattened pixel axis (>= Wp + 1)


def double_conv_kernel(x_ref, mask_ref, w1_ref, g1_ref, be1_ref,
                       w2_ref, g2_ref, be2_ref, o_ref, a1m_ref, *, Wp, n_valid):
    L = o_ref.shape[-1]                      # flattened pixel axis, multiple of 128
    mask = mask_ref[...]                     # (1, L): 1.0 on valid output pixels, else 0.0
    inv_n = 1.0 / n_valid

    # 3x3 tap offsets in flattened padded-image coordinates, tap = ky*3 + kx.
    offs = [(ky - 1) * Wp + (kx - 1) for ky in range(3) for kx in range(3)]
    CENTER = 4                               # (ky, kx) = (1, 1): offset 0

    def conv3x3(src_ref, w_ref, center_operand):
        # Direct shifted-window accumulation: one small bf16 MXU dot per tap, the RHS read
        # straight from the margined ref (no im2col scratch, no extra stores).  The center
        # tap uses the supplied live value (bypasses the staging buffer for conv2).
        acc = jnp.dot(w_ref[CENTER], center_operand, preferred_element_type=jnp.float32)
        for tap, off in enumerate(offs):
            if tap == CENTER:
                continue
            start = MARGIN + off
            acc = acc + jnp.dot(w_ref[tap], src_ref[:, start:start + L],
                                preferred_element_type=jnp.float32)
        return acc

    def bn_relu(y, g_ref, be_ref):
        # Training-mode BatchNorm2d: biased batch stats over the N*H*W valid pixels.
        # Conv bias omitted upstream: it is cancelled exactly by the mean subtraction.
        cout = y.shape[0]
        ym = y * mask
        # Fused single cross-lane reduction for sum and sum-of-squares (one XLU pass).
        stats = jnp.sum(jnp.concatenate([ym, ym * ym], axis=0),
                        axis=1, keepdims=True) * inv_n            # (2*Cout, 1)
        mean = stats[:cout]
        var = jnp.maximum(stats[cout:] - mean * mean, 0.0)        # clamp f32 cancellation
        a = (y - mean) * lax.rsqrt(var + EPS) * g_ref[...] + be_ref[...]
        # Re-zero halo / tail lanes: they are the zero padding of the next conv.
        return jnp.maximum(a, 0.0) * mask

    # ---- conv1 -> BN -> ReLU ----------------------------------------------------------
    y1 = conv3x3(x_ref, w1_ref, x_ref[:, MARGIN:MARGIN + L])
    a1 = bn_relu(y1, g1_ref, be1_ref)
    a1_bf = a1.astype(jnp.bfloat16)

    # Stage conv1 activation (bf16) with zeroed lane margins for conv2's 8 shifted reads;
    # the center tap of conv2 consumes the live a1_bf value directly.
    cout = a1_bf.shape[0]
    a1m_ref[:, :MARGIN] = jnp.zeros((cout, MARGIN), jnp.bfloat16)
    a1m_ref[:, MARGIN + L:] = jnp.zeros((cout, MARGIN), jnp.bfloat16)
    a1m_ref[:, MARGIN:MARGIN + L] = a1_bf

    # ---- conv2 -> BN -> ReLU ----------------------------------------------------------
    y2 = conv3x3(a1m_ref, w2_ref, a1_bf)
    o_ref[...] = bn_relu(y2, g2_ref, be2_ref)


@jax.jit
def double_conv(x_nchw, params):
    """Pallas DoubleConv. x_nchw: (N, Cin, H, W) f32 -> (N, Cout, H, W) f32."""
    w1, _b1, g1, be1, w2, _b2, g2, be2 = params   # conv biases cancelled by BatchNorm
    N, Cin, H, W = x_nchw.shape
    Cout = w1.shape[0]
    Hp, Wp = H + 2, W + 2
    P = Hp * Wp                                   # pixels per zero-padded image
    NP = N * P                                    # all images, contiguous (no per-image pad)
    L = pl.cdiv(NP, 128) * 128                    # lane-aligned flattened pixel axis

    # NCHW -> channel-major (Cin, N, Hp, Wp), zero-pad spatially, flatten ALL images
    # contiguously onto lanes, zero tail to L and add a zero MARGIN on both ends; bf16.
    x = jnp.transpose(x_nchw, (1, 0, 2, 3))
    xp = jnp.pad(x, ((0, 0), (0, 0), (1, 1), (1, 1))).reshape(Cin, NP)
    xf = jnp.pad(xp, ((0, 0), (MARGIN, MARGIN + L - NP))).astype(jnp.bfloat16)

    # Conv weights (Cout, Cin, 3, 3) -> (9, Cout, Cin), tap-major (ky, kx).
    wk1 = jnp.transpose(w1, (2, 3, 0, 1)).reshape(9, Cout, Cin).astype(jnp.bfloat16)
    wk2 = jnp.transpose(w2, (2, 3, 0, 1)).reshape(9, Cout, Cout).astype(jnp.bfloat16)
    col = lambda v: v.reshape(-1, 1).astype(jnp.float32)          # (Cout, 1) channel-major

    # Mask of valid output pixels: interior rows/cols of each padded image, no tail.
    q = jnp.arange(L)
    p = q % P
    r = p // Wp
    c = p % Wp
    mask = ((q < NP) & (r >= 1) & (r <= H) & (c >= 1) & (c <= W))
    mask = mask.astype(jnp.float32).reshape(1, L)

    kernel = functools.partial(double_conv_kernel, Wp=Wp, n_valid=N * H * W)
    out_flat = pl.pallas_call(
        kernel,
        out_shape=jax.ShapeDtypeStruct((Cout, L), jnp.float32),
        in_specs=[pl.BlockSpec(memory_space=pltpu.MemorySpace.VMEM)] * 8,
        out_specs=pl.BlockSpec(memory_space=pltpu.MemorySpace.VMEM),
        scratch_shapes=[
            pltpu.VMEM((Cout, L + 2 * MARGIN), jnp.bfloat16),     # margined conv1 activation
        ],
        # 32 MiB is the v7x scoped default; keep the single config portable (v5e/v6e have
        # plenty of headroom at these shapes).
        compiler_params=pltpu.CompilerParams(vmem_limit_bytes=32 * 1024 * 1024),
    )(xf, mask, wk1, col(g1), col(be1), wk2, col(g2), col(be2))

    # (Cout, L) -> (N, Cout, H, W): drop the tail padding and the 1-pixel halo.
    out = out_flat[:, :NP].reshape(Cout, N, Hp, Wp)[:, :, 1:1 + H, 1:1 + W]
    return jnp.transpose(out, (1, 0, 2, 3))


def reference(x_nchw, params):
    """Pure-JAX reference (same bf16 conv operands / f32 accumulation as the kernel)."""
    w1, b1, g1, be1, w2, b2, g2, be2 = params

    def block(x, w, b, g, be):
        y = lax.conv_general_dilated(
            x.astype(jnp.bfloat16), w.astype(jnp.bfloat16), (1, 1), 'SAME',
            dimension_numbers=('NCHW', 'OIHW', 'NCHW'),
            preferred_element_type=jnp.float32)
        y = y + b[None, :, None, None]
        mean = jnp.mean(y, axis=(0, 2, 3), keepdims=True)
        var = jnp.mean((y - mean) ** 2, axis=(0, 2, 3), keepdims=True)
        y = (y - mean) * lax.rsqrt(var + EPS) * g[None, :, None, None] + be[None, :, None, None]
        return jnp.maximum(y, 0.0)

    return block(block(x_nchw, w1, b1, g1, be1), w2, b2, g2, be2)


if __name__ == "__main__":
    N, Cin, Cout, H, W = 2, 4, 8, 16, 16

    key = jax.random.PRNGKey(0)
    kx, k1, k2, k3, k4, k5, k6, k7, k8 = jax.random.split(key, 9)

    x = jax.random.normal(kx, (N, Cin, H, W), dtype=jnp.float32)

    # Deterministic synthetic parameters (shapes from DoubleConv.__init__).
    w1 = 0.1 * jax.random.normal(k1, (Cout, Cin, 3, 3), dtype=jnp.float32)
    b1 = 0.1 * jax.random.normal(k2, (Cout,), dtype=jnp.float32)
    g1 = 1.0 + 0.1 * jax.random.normal(k3, (Cout,), dtype=jnp.float32)
    be1 = 0.1 * jax.random.normal(k4, (Cout,), dtype=jnp.float32)
    w2 = 0.1 * jax.random.normal(k5, (Cout, Cout, 3, 3), dtype=jnp.float32)
    b2 = 0.1 * jax.random.normal(k6, (Cout,), dtype=jnp.float32)
    g2 = 1.0 + 0.1 * jax.random.normal(k7, (Cout,), dtype=jnp.float32)
    be2 = 0.1 * jax.random.normal(k8, (Cout,), dtype=jnp.float32)

    params = (w1, b1, g1, be1, w2, b2, g2, be2)

    out = jax.block_until_ready(double_conv(x, params))
    ref = jax.block_until_ready(reference(x, params))

    assert out.shape == (N, Cout, H, W), out.shape
    # Tolerance reflects bf16 MXU operands (f32 accumulation) in both kernel & reference.
    err = float(jnp.max(jnp.abs(out - ref)))
    assert err < 1e-2, err

    print("KERNEL_OK")
</pallas_src>

<mosaic_0001>
module attributes {stable_mosaic.version = 11 : i64} {
  func.func @double_conv_kernel(%arg0: memref<4x1024xbf16, #tpu.memory_space<vmem>>, %arg1: memref<1x768xf32, #tpu.memory_space<vmem>>, %arg2: memref<9x8x4xbf16, #tpu.memory_space<vmem>>, %arg3: memref<8x1xf32, #tpu.memory_space<vmem>>, %arg4: memref<8x1xf32, #tpu.memory_space<vmem>>, %arg5: memref<9x8x8xbf16, #tpu.memory_space<vmem>>, %arg6: memref<8x1xf32, #tpu.memory_space<vmem>>, %arg7: memref<8x1xf32, #tpu.memory_space<vmem>>, %arg8: memref<8x768xf32, #tpu.memory_space<vmem>>, %arg9: memref<8x1024xbf16, #tpu.memory_space<vmem>>) attributes {dimension_semantics = [], scalar_prefetch = 0 : i64, scratch_operands = 1 : i64, tpu.core_type = #tpu.core_type<tc>} {
    %c0 = arith.constant 0 : index
    %c0_0 = arith.constant 0 : index
    %0 = vector.load %arg1[%c0, %c0_0] : memref<1x768xf32, #tpu.memory_space<vmem>>, vector<1x768xf32>
    %c0_1 = arith.constant 0 : index
    %c128 = arith.constant 128 : index
    %1 = vector.load %arg0[%c0_1, %c128] : memref<4x1024xbf16, #tpu.memory_space<vmem>>, vector<4x768xbf16>
    %c4 = arith.constant 4 : index
    %c0_2 = arith.constant 0 : index
    %c0_3 = arith.constant 0 : index
    %2 = vector.load %arg2[%c4, %c0_2, %c0_3] : memref<9x8x4xbf16, #tpu.memory_space<vmem>>, vector<1x8x4xbf16>
    %3 = vector.shape_cast %2 : vector<1x8x4xbf16> to vector<8x4xbf16>
    %cst = arith.constant dense<0.000000e+00> : vector<8x768xf32>
    %4 = tpu.matmul %3, %1, %cst {dimension_numbers = #tpu.dot_dimension_numbers<[1], [0], [0], [1], [0, 0, 1, 1], [], []>} : vector<8x4xbf16>, vector<4x768xbf16>, vector<8x768xf32> -> vector<8x768xf32>
    %c0_4 = arith.constant 0 : index
    %c0_5 = arith.constant 0 : index
    %c0_6 = arith.constant 0 : index
    %5 = vector.load %arg2[%c0_4, %c0_5, %c0_6] : memref<9x8x4xbf16, #tpu.memory_space<vmem>>, vector<1x8x4xbf16>
    %6 = vector.shape_cast %5 : vector<1x8x4xbf16> to vector<8x4xbf16>
    %c0_7 = arith.constant 0 : index
    %c109 = arith.constant 109 : index
    %7 = vector.load %arg0[%c0_7, %c109] : memref<4x1024xbf16, #tpu.memory_space<vmem>>, vector<4x768xbf16>
    %cst_8 = arith.constant dense<0.000000e+00> : vector<8x768xf32>
    %8 = tpu.matmul %6, %7, %cst_8 {dimension_numbers = #tpu.dot_dimension_numbers<[1], [0], [0], [1], [0, 0, 1, 1], [], []>} : vector<8x4xbf16>, vector<4x768xbf16>, vector<8x768xf32> -> vector<8x768xf32>
    %9 = arith.addf %4, %8 : vector<8x768xf32>
    %c1 = arith.constant 1 : index
    %c0_9 = arith.constant 0 : index
    %c0_10 = arith.constant 0 : index
    %10 = vector.load %arg2[%c1, %c0_9, %c0_10] : memref<9x8x4xbf16, #tpu.memory_space<vmem>>, vector<1x8x4xbf16>
    %11 = vector.shape_cast %10 : vector<1x8x4xbf16> to vector<8x4xbf16>
    %c0_11 = arith.constant 0 : index
    %c110 = arith.constant 110 : index
    %12 = vector.load %arg0[%c0_11, %c110] : memref<4x1024xbf16, #tpu.memory_space<vmem>>, vector<4x768xbf16>
    %cst_12 = arith.constant dense<0.000000e+00> : vector<8x768xf32>
    %13 = tpu.matmul %11, %12, %cst_12 {dimension_numbers = #tpu.dot_dimension_numbers<[1], [0], [0], [1], [0, 0, 1, 1], [], []>} : vector<8x4xbf16>, vector<4x768xbf16>, vector<8x768xf32> -> vector<8x768xf32>
    %14 = arith.addf %9, %13 : vector<8x768xf32>
    %c2 = arith.constant 2 : index
    %c0_13 = arith.constant 0 : index
    %c0_14 = arith.constant 0 : index
    %15 = vector.load %arg2[%c2, %c0_13, %c0_14] : memref<9x8x4xbf16, #tpu.memory_space<vmem>>, vector<1x8x4xbf16>
    %16 = vector.shape_cast %15 : vector<1x8x4xbf16> to vector<8x4xbf16>
    %c0_15 = arith.constant 0 : index
    %c111 = arith.constant 111 : index
    %17 = vector.load %arg0[%c0_15, %c111] : memref<4x1024xbf16, #tpu.memory_space<vmem>>, vector<4x768xbf16>
    %cst_16 = arith.constant dense<0.000000e+00> : vector<8x768xf32>
    %18 = tpu.matmul %16, %17, %cst_16 {dimension_numbers = #tpu.dot_dimension_numbers<[1], [0], [0], [1], [0, 0, 1, 1], [], []>} : vector<8x4xbf16>, vector<4x768xbf16>, vector<8x768xf32> -> vector<8x768xf32>
    %19 = arith.addf %14, %18 : vector<8x768xf32>
    %c3 = arith.constant 3 : index
    %c0_17 = arith.constant 0 : index
    %c0_18 = arith.constant 0 : index
    %20 = vector.load %arg2[%c3, %c0_17, %c0_18] : memref<9x8x4xbf16, #tpu.memory_space<vmem>>, vector<1x8x4xbf16>
    %21 = vector.shape_cast %20 : vector<1x8x4xbf16> to vector<8x4xbf16>
    %c0_19 = arith.constant 0 : index
    %c127 = arith.constant 127 : index
    %22 = vector.load %arg0[%c0_19, %c127] : memref<4x1024xbf16, #tpu.memory_space<vmem>>, vector<4x768xbf16>
    %cst_20 = arith.constant dense<0.000000e+00> : vector<8x768xf32>
    %23 = tpu.matmul %21, %22, %cst_20 {dimension_numbers = #tpu.dot_dimension_numbers<[1], [0], [0], [1], [0, 0, 1, 1], [], []>} : vector<8x4xbf16>, vector<4x768xbf16>, vector<8x768xf32> -> vector<8x768xf32>
    %24 = arith.addf %19, %23 : vector<8x768xf32>
    %c5 = arith.constant 5 : index
    %c0_21 = arith.constant 0 : index
    %c0_22 = arith.constant 0 : index
    %25 = vector.load %arg2[%c5, %c0_21, %c0_22] : memref<9x8x4xbf16, #tpu.memory_space<vmem>>, vector<1x8x4xbf16>
    %26 = vector.shape_cast %25 : vector<1x8x4xbf16> to vector<8x4xbf16>
    %c0_23 = arith.constant 0 : index
    %c129 = arith.constant 129 : index
    %27 = vector.load %arg0[%c0_23, %c129] : memref<4x1024xbf16, #tpu.memory_space<vmem>>, vector<4x768xbf16>
    %cst_24 = arith.constant dense<0.000000e+00> : vector<8x768xf32>
    %28 = tpu.matmul %26, %27, %cst_24 {dimension_numbers = #tpu.dot_dimension_numbers<[1], [0], [0], [1], [0, 0, 1, 1], [], []>} : vector<8x4xbf16>, vector<4x768xbf16>, vector<8x768xf32> -> vector<8x768xf32>
    %29 = arith.addf %24, %28 : vector<8x768xf32>
    %c6 = arith.constant 6 : index
    %c0_25 = arith.constant 0 : index
    %c0_26 = arith.constant 0 : index
    %30 = vector.load %arg2[%c6, %c0_25, %c0_26] : memref<9x8x4xbf16, #tpu.memory_space<vmem>>, vector<1x8x4xbf16>
    %31 = vector.shape_cast %30 : vector<1x8x4xbf16> to vector<8x4xbf16>
    %c0_27 = arith.constant 0 : index
    %c145 = arith.constant 145 : index
    %32 = vector.load %arg0[%c0_27, %c145] : memref<4x1024xbf16, #tpu.memory_space<vmem>>, vector<4x768xbf16>
    %cst_28 = arith.constant dense<0.000000e+00> : vector<8x768xf32>
    %33 = tpu.matmul %31, %32, %cst_28 {dimension_numbers = #tpu.dot_dimension_numbers<[1], [0], [0], [1], [0, 0, 1, 1], [], []>} : vector<8x4xbf16>, vector<4x768xbf16>, vector<8x768xf32> -> vector<8x768xf32>
    %34 = arith.addf %29, %33 : vector<8x768xf32>
    %c7 = arith.constant 7 : index
    %c0_29 = arith.constant 0 : index
    %c0_30 = arith.constant 0 : index
    %35 = vector.load %arg2[%c7, %c0_29, %c0_30] : memref<9x8x4xbf16, #tpu.memory_space<vmem>>, vector<1x8x4xbf16>
    %36 = vector.shape_cast %35 : vector<1x8x4xbf16> to vector<8x4xbf16>
    %c0_31 = arith.constant 0 : index
    %c146 = arith.constant 146 : index
    %37 = vector.load %arg0[%c0_31, %c146] : memref<4x1024xbf16, #tpu.memory_space<vmem>>, vector<4x768xbf16>
    %cst_32 = arith.constant dense<0.000000e+00> : vector<8x768xf32>
    %38 = tpu.matmul %36, %37, %cst_32 {dimension_numbers = #tpu.dot_dimension_numbers<[1], [0], [0], [1], [0, 0, 1, 1], [], []>} : vector<8x4xbf16>, vector<4x768xbf16>, vector<8x768xf32> -> vector<8x768xf32>
    %39 = arith.addf %34, %38 : vector<8x768xf32>
    %c8 = arith.constant 8 : index
    %c0_33 = arith.constant 0 : index
    %c0_34 = arith.constant 0 : index
    %40 = vector.load %arg2[%c8, %c0_33, %c0_34] : memref<9x8x4xbf16, #tpu.memory_space<vmem>>, vector<1x8x4xbf16>
    %41 = vector.shape_cast %40 : vector<1x8x4xbf16> to vector<8x4xbf16>
    %c0_35 = arith.constant 0 : index
    %c147 = arith.constant 147 : index
    %42 = vector.load %arg0[%c0_35, %c147] : memref<4x1024xbf16, #tpu.memory_space<vmem>>, vector<4x768xbf16>
    %cst_36 = arith.constant dense<0.000000e+00> : vector<8x768xf32>
    %43 = tpu.matmul %41, %42, %cst_36 {dimension_numbers = #tpu.dot_dimension_numbers<[1], [0], [0], [1], [0, 0, 1, 1], [], []>} : vector<8x4xbf16>, vector<4x768xbf16>, vector<8x768xf32> -> vector<8x768xf32>
    %44 = arith.addf %39, %43 : vector<8x768xf32>
    %45 = vector.broadcast %0 : vector<1x768xf32> to vector<8x768xf32>
    %46 = arith.mulf %44, %45 : vector<8x768xf32>
    %47 = arith.mulf %46, %46 : vector<8x768xf32>
    %48 = tpu.concatenate %46, %47 in 0 : vector<8x768xf32>, vector<8x768xf32> -> vector<16x768xf32>
    %cst_37 = arith.constant dense<0.000000e+00> : vector<16xf32>
    %49 = vector.multi_reduction <add>, %48, %cst_37 [1] : vector<16x768xf32> to vector<16xf32>
    %50 = vector.shape_cast %49 : vector<16xf32> to vector<16x1xf32>
    %cst_38 = arith.constant 0.001953125 : f32
    %51 = vector.broadcast %cst_38 : f32 to vector<16x1xf32>
    %52 = arith.mulf %50, %51 : vector<16x1xf32>
    %53 = vector.extract_strided_slice %52 {offsets = [0, 0], sizes = [8, 1], strides = [1, 1]} : vector<16x1xf32> to vector<8x1xf32>
    %54 = vector.extract_strided_slice %52 {offsets = [8, 0], sizes = [8, 1], strides = [1, 1]} : vector<16x1xf32> to vector<8x1xf32>
    %55 = arith.mulf %53, %53 : vector<8x1xf32>
    %56 = arith.subf %54, %55 : vector<8x1xf32>
    %cst_39 = arith.constant 0.000000e+00 : f32
    %57 = vector.broadcast %cst_39 : f32 to vector<8x1xf32>
    %58 = arith.maximumf %56, %57 : vector<8x1xf32>
    %59 = vector.broadcast %53 : vector<8x1xf32> to vector<8x768xf32>
    %60 = arith.subf %44, %59 : vector<8x768xf32>
    %cst_40 = arith.constant 9.99999974E-6 : f32
    %61 = vector.broadcast %cst_40 : f32 to vector<8x1xf32>
    %62 = arith.addf %58, %61 : vector<8x1xf32>
    %63 = math.rsqrt %62 : vector<8x1xf32>
    %64 = vector.broadcast %63 : vector<8x1xf32> to vector<8x768xf32>
    %65 = arith.mulf %60, %64 : vector<8x768xf32>
    %c0_41 = arith.constant 0 : index
    %c0_42 = arith.constant 0 : index
    %66 = vector.load %arg3[%c0_41, %c0_42] : memref<8x1xf32, #tpu.memory_space<vmem>>, vector<8x1xf32>
    %67 = vector.broadcast %66 : vector<8x1xf32> to vector<8x768xf32>
    %68 = arith.mulf %65, %67 : vector<8x768xf32>
    %c0_43 = arith.constant 0 : index
    %c0_44 = arith.constant 0 : index
    %69 = vector.load %arg4[%c0_43, %c0_44] : memref<8x1xf32, #tpu.memory_space<vmem>>, vector<8x1xf32>
    %70 = vector.broadcast %69 : vector<8x1xf32> to vector<8x768xf32>
    %71 = arith.addf %68, %70 : vector<8x768xf32>
    %cst_45 = arith.constant 0.000000e+00 : f32
    %72 = vector.broadcast %cst_45 : f32 to vector<8x768xf32>
    %73 = arith.maximumf %71, %72 : vector<8x768xf32>
    %74 = vector.broadcast %0 : vector<1x768xf32> to vector<8x768xf32>
    %75 = arith.mulf %73, %74 : vector<8x768xf32>
    %76 = arith.truncf %75 : vector<8x768xf32> to vector<8x768xbf16>
    %cst_46 = arith.constant 0.000000e+00 : bf16
    %77 = vector.broadcast %cst_46 : bf16 to vector<8x128xbf16>
    %c0_47 = arith.constant 0 : index
    %c0_48 = arith.constant 0 : index
    %78 = vector.load %arg9[%c0_47, %c0_48] : memref<8x1024xbf16, #tpu.memory_space<vmem>>, vector<8x128xbf16>
    tpu.vector_store %arg9[%c0_47, %c0_48], %77 {strides = array<i32>} : memref<8x1024xbf16, #tpu.memory_space<vmem>>, vector<8x128xbf16>,
    %cst_49 = arith.constant 0.000000e+00 : bf16
    %79 = vector.broadcast %cst_49 : bf16 to vector<8x128xbf16>
    %c0_50 = arith.constant 0 : index
    %c896 = arith.constant 896 : index
    %80 = vector.load %arg9[%c0_50, %c896] : memref<8x1024xbf16, #tpu.memory_space<vmem>>, vector<8x128xbf16>
    tpu.vector_store %arg9[%c0_50, %c896], %79 {strides = array<i32>} : memref<8x1024xbf16, #tpu.memory_space<vmem>>, vector<8x128xbf16>,
    %c0_51 = arith.constant 0 : index
    %c128_52 = arith.constant 128 : index
    %81 = vector.load %arg9[%c0_51, %c128_52] : memref<8x1024xbf16, #tpu.memory_space<vmem>>, vector<8x768xbf16>
    tpu.vector_store %arg9[%c0_51, %c128_52], %76 {strides = array<i32>} : memref<8x1024xbf16, #tpu.memory_space<vmem>>, vector<8x768xbf16>,
    %c4_53 = arith.constant 4 : index
    %c0_54 = arith.constant 0 : index
    %c0_55 = arith.constant 0 : index
    %82 = vector.load %arg5[%c4_53, %c0_54, %c0_55] : memref<9x8x8xbf16, #tpu.memory_space<vmem>>, vector<1x8x8xbf16>
    %83 = vector.shape_cast %82 : vector<1x8x8xbf16> to vector<8x8xbf16>
    %cst_56 = arith.constant dense<0.000000e+00> : vector<8x768xf32>
    %84 = tpu.matmul %83, %76, %cst_56 {dimension_numbers = #tpu.dot_dimension_numbers<[1], [0], [0], [1], [0, 0, 1, 1], [], []>} : vector<8x8xbf16>, vector<8x768xbf16>, vector<8x768xf32> -> vector<8x768xf32>
    %c0_57 = arith.constant 0 : index
    %c0_58 = arith.constant 0 : index
    %c0_59 = arith.constant 0 : index
    %85 = vector.load %arg5[%c0_57, %c0_58, %c0_59] : memref<9x8x8xbf16, #tpu.memory_space<vmem>>, vector<1x8x8xbf16>
    %86 = vector.shape_cast %85 : vector<1x8x8xbf16> to vector<8x8xbf16>
    %c0_60 = arith.constant 0 : index
    %c109_61 = arith.constant 109 : index
    %87 = vector.load %arg9[%c0_60, %c109_61] : memref<8x1024xbf16, #tpu.memory_space<vmem>>, vector<8x768xbf16>
    %cst_62 = arith.constant dense<0.000000e+00> : vector<8x768xf32>
    %88 = tpu.matmul %86, %87, %cst_62 {dimension_numbers = #tpu.dot_dimension_numbers<[1], [0], [0], [1], [0, 0, 1, 1], [], []>} : vector<8x8xbf16>, vector<8x768xbf16>, vector<8x768xf32> -> vector<8x768xf32>
    %89 = arith.addf %84, %88 : vector<8x768xf32>
    %c1_63 = arith.constant 1 : index
    %c0_64 = arith.constant 0 : index
    %c0_65 = arith.constant 0 : index
    %90 = vector.load %arg5[%c1_63, %c0_64, %c0_65] : memref<9x8x8xbf16, #tpu.memory_space<vmem>>, vector<1x8x8xbf16>
    %91 = vector.shape_cast %90 : vector<1x8x8xbf16> to vector<8x8xbf16>
    %c0_66 = arith.constant 0 : index
    %c110_67 = arith.constant 110 : index
    %92 = vector.load %arg9[%c0_66, %c110_67] : memref<8x1024xbf16, #tpu.memory_space<vmem>>, vector<8x768xbf16>
    %cst_68 = arith.constant dense<0.000000e+00> : vector<8x768xf32>
    %93 = tpu.matmul %91, %92, %cst_68 {dimension_numbers = #tpu.dot_dimension_numbers<[1], [0], [0], [1], [0, 0, 1, 1], [], []>} : vector<8x8xbf16>, vector<8x768xbf16>, vector<8x768xf32> -> vector<8x768xf32>
    %94 = arith.addf %89, %93 : vector<8x768xf32>
    %c2_69 = arith.constant 2 : index
    %c0_70 = arith.constant 0 : index
    %c0_71 = arith.constant 0 : index
    %95 = vector.load %arg5[%c2_69, %c0_70, %c0_71] : memref<9x8x8xbf16, #tpu.memory_space<vmem>>, vector<1x8x8xbf16>
    %96 = vector.shape_cast %95 : vector<1x8x8xbf16> to vector<8x8xbf16>
    %c0_72 = arith.constant 0 : index
    %c111_73 = arith.constant 111 : index
    %97 = vector.load %arg9[%c0_72, %c111_73] : memref<8x1024xbf16, #tpu.memory_space<vmem>>, vector<8x768xbf16>
    %cst_74 = arith.constant dense<0.000000e+00> : vector<8x768xf32>
    %98 = tpu.matmul %96, %97, %cst_74 {dimension_numbers = #tpu.dot_dimension_numbers<[1], [0], [0], [1], [0, 0, 1, 1], [], []>} : vector<8x8xbf16>, vector<8x768xbf16>, vector<8x768xf32> -> vector<8x768xf32>
    %99 = arith.addf %94, %98 : vector<8x768xf32>
    %c3_75 = arith.constant 3 : index
    %c0_76 = arith.constant 0 : index
    %c0_77 = arith.constant 0 : index
    %100 = vector.load %arg5[%c3_75, %c0_76, %c0_77] : memref<9x8x8xbf16, #tpu.memory_space<vmem>>, vector<1x8x8xbf16>
    %101 = vector.shape_cast %100 : vector<1x8x8xbf16> to vector<8x8xbf16>
    %c0_78 = arith.constant 0 : index
    %c127_79 = arith.constant 127 : index
    %102 = vector.load %arg9[%c0_78, %c127_79] : memref<8x1024xbf16, #tpu.memory_space<vmem>>, vector<8x768xbf16>
    %cst_80 = arith.constant dense<0.000000e+00> : vector<8x768xf32>
    %103 = tpu.matmul %101, %102, %cst_80 {dimension_numbers = #tpu.dot_dimension_numbers<[1], [0], [0], [1], [0, 0, 1, 1], [], []>} : vector<8x8xbf16>, vector<8x768xbf16>, vector<8x768xf32> -> vector<8x768xf32>
    %104 = arith.addf %99, %103 : vector<8x768xf32>
    %c5_81 = arith.constant 5 : index
    %c0_82 = arith.constant 0 : index
    %c0_83 = arith.constant 0 : index
    %105 = vector.load %arg5[%c5_81, %c0_82, %c0_83] : memref<9x8x8xbf16, #tpu.memory_space<vmem>>, vector<1x8x8xbf16>
    %106 = vector.shape_cast %105 : vector<1x8x8xbf16> to vector<8x8xbf16>
    %c0_84 = arith.constant 0 : index
    %c129_85 = arith.constant 129 : index
    %107 = vector.load %arg9[%c0_84, %c129_85] : memref<8x1024xbf16, #tpu.memory_space<vmem>>, vector<8x768xbf16>
    %cst_86 = arith.constant dense<0.000000e+00> : vector<8x768xf32>
    %108 = tpu.matmul %106, %107, %cst_86 {dimension_numbers = #tpu.dot_dimension_numbers<[1], [0], [0], [1], [0, 0, 1, 1], [], []>} : vector<8x8xbf16>, vector<8x768xbf16>, vector<8x768xf32> -> vector<8x768xf32>
    %109 = arith.addf %104, %108 : vector<8x768xf32>
    %c6_87 = arith.constant 6 : index
    %c0_88 = arith.constant 0 : index
    %c0_89 = arith.constant 0 : index
    %110 = vector.load %arg5[%c6_87, %c0_88, %c0_89] : memref<9x8x8xbf16, #tpu.memory_space<vmem>>, vector<1x8x8xbf16>
    %111 = vector.shape_cast %110 : vector<1x8x8xbf16> to vector<8x8xbf16>
    %c0_90 = arith.constant 0 : index
    %c145_91 = arith.constant 145 : index
    %112 = vector.load %arg9[%c0_90, %c145_91] : memref<8x1024xbf16, #tpu.memory_space<vmem>>, vector<8x768xbf16>
    %cst_92 = arith.constant dense<0.000000e+00> : vector<8x768xf32>
    %113 = tpu.matmul %111, %112, %cst_92 {dimension_numbers = #tpu.dot_dimension_numbers<[1], [0], [0], [1], [0, 0, 1, 1], [], []>} : vector<8x8xbf16>, vector<8x768xbf16>, vector<8x768xf32> -> vector<8x768xf32>
    %114 = arith.addf %109, %113 : vector<8x768xf32>
    %c7_93 = arith.constant 7 : index
    %c0_94 = arith.constant 0 : index
    %c0_95 = arith.constant 0 : index
    %115 = vector.load %arg5[%c7_93, %c0_94, %c0_95] : memref<9x8x8xbf16, #tpu.memory_space<vmem>>, vector<1x8x8xbf16>
    %116 = vector.shape_cast %115 : vector<1x8x8xbf16> to vector<8x8xbf16>
    %c0_96 = arith.constant 0 : index
    %c146_97 = arith.constant 146 : index
    %117 = vector.load %arg9[%c0_96, %c146_97] : memref<8x1024xbf16, #tpu.memory_space<vmem>>, vector<8x768xbf16>
    %cst_98 = arith.constant dense<0.000000e+00> : vector<8x768xf32>
    %118 = tpu.matmul %116, %117, %cst_98 {dimension_numbers = #tpu.dot_dimension_numbers<[1], [0], [0], [1], [0, 0, 1, 1], [], []>} : vector<8x8xbf16>, vector<8x768xbf16>, vector<8x768xf32> -> vector<8x768xf32>
    %119 = arith.addf %114, %118 : vector<8x768xf32>
    %c8_99 = arith.constant 8 : index
    %c0_100 = arith.constant 0 : index
    %c0_101 = arith.constant 0 : index
    %120 = vector.load %arg5[%c8_99, %c0_100, %c0_101] : memref<9x8x8xbf16, #tpu.memory_space<vmem>>, vector<1x8x8xbf16>
    %121 = vector.shape_cast %120 : vector<1x8x8xbf16> to vector<8x8xbf16>
    %c0_102 = arith.constant 0 : index
    %c147_103 = arith.constant 147 : index
    %122 = vector.load %arg9[%c0_102, %c147_103] : memref<8x1024xbf16, #tpu.memory_space<vmem>>, vector<8x768xbf16>
    %cst_104 = arith.constant dense<0.000000e+00> : vector<8x768xf32>
    %123 = tpu.matmul %121, %122, %cst_104 {dimension_numbers = #tpu.dot_dimension_numbers<[1], [0], [0], [1], [0, 0, 1, 1], [], []>} : vector<8x8xbf16>, vector<8x768xbf16>, vector<8x768xf32> -> vector<8x768xf32>
    %124 = arith.addf %119, %123 : vector<8x768xf32>
    %125 = vector.broadcast %0 : vector<1x768xf32> to vector<8x768xf32>
    %126 = arith.mulf %124, %125 : vector<8x768xf32>
    %127 = arith.mulf %126, %126 : vector<8x768xf32>
    %128 = tpu.concatenate %126, %127 in 0 : vector<8x768xf32>, vector<8x768xf32> -> vector<16x768xf32>
    %cst_105 = arith.constant dense<0.000000e+00> : vector<16xf32>
    %129 = vector.multi_reduction <add>, %128, %cst_105 [1] : vector<16x768xf32> to vector<16xf32>
    %130 = vector.shape_cast %129 : vector<16xf32> to vector<16x1xf32>
    %cst_106 = arith.constant 0.001953125 : f32
    %131 = vector.broadcast %cst_106 : f32 to vector<16x1xf32>
    %132 = arith.mulf %130, %131 : vector<16x1xf32>
    %133 = vector.extract_strided_slice %132 {offsets = [0, 0], sizes = [8, 1], strides = [1, 1]} : vector<16x1xf32> to vector<8x1xf32>
    %134 = vector.extract_strided_slice %132 {offsets = [8, 0], sizes = [8, 1], strides = [1, 1]} : vector<16x1xf32> to vector<8x1xf32>
    %135 = arith.mulf %133, %133 : vector<8x1xf32>
    %136 = arith.subf %134, %135 : vector<8x1xf32>
    %cst_107 = arith.constant 0.000000e+00 : f32
    %137 = vector.broadcast %cst_107 : f32 to vector<8x1xf32>
    %138 = arith.maximumf %136, %137 : vector<8x1xf32>
    %139 = vector.broadcast %133 : vector<8x1xf32> to vector<8x768xf32>
    %140 = arith.subf %124, %139 : vector<8x768xf32>
    %cst_108 = arith.constant 9.99999974E-6 : f32
    %141 = vector.broadcast %cst_108 : f32 to vector<8x1xf32>
    %142 = arith.addf %138, %141 : vector<8x1xf32>
    %143 = math.rsqrt %142 : vector<8x1xf32>
    %144 = vector.broadcast %143 : vector<8x1xf32> to vector<8x768xf32>
    %145 = arith.mulf %140, %144 : vector<8x768xf32>
    %c0_109 = arith.constant 0 : index
    %c0_110 = arith.constant 0 : index
    %146 = vector.load %arg6[%c0_109, %c0_110] : memref<8x1xf32, #tpu.memory_space<vmem>>, vector<8x1xf32>
    %147 = vector.broadcast %146 : vector<8x1xf32> to vector<8x768xf32>
    %148 = arith.mulf %145, %147 : vector<8x768xf32>
    %c0_111 = arith.constant 0 : index
    %c0_112 = arith.constant 0 : index
    %149 = vector.load %arg7[%c0_111, %c0_112] : memref<8x1xf32, #tpu.memory_space<vmem>>, vector<8x1xf32>
    %150 = vector.broadcast %149 : vector<8x1xf32> to vector<8x768xf32>
    %151 = arith.addf %148, %150 : vector<8x768xf32>
    %cst_113 = arith.constant 0.000000e+00 : f32
    %152 = vector.broadcast %cst_113 : f32 to vector<8x768xf32>
    %153 = arith.maximumf %151, %152 : vector<8x768xf32>
    %154 = vector.broadcast %0 : vector<1x768xf32> to vector<8x768xf32>
    %155 = arith.mulf %153, %154 : vector<8x768xf32>
    %c0_114 = arith.constant 0 : index
    %c0_115 = arith.constant 0 : index
    %156 = vector.load %arg8[%c0_114, %c0_115] : memref<8x768xf32, #tpu.memory_space<vmem>>, vector<8x768xf32>
    tpu.vector_store %arg8[%c0_114, %c0_115], %155 {strides = array<i32>} : memref<8x768xf32, #tpu.memory_space<vmem>>, vector<8x768xf32>,
    return
  }
}

</mosaic_0001>

<bundles_post_ra>
// kernel: double_conv.1
= control target key start
LH: loop header
LB: loop body
LE: loop exit
PB: predicated region body
PF: predicated region fallthrough
CT: control target
= control target key end

     0   :  { %v44_v0 = vlaneseq  ;;  %v4051_v2 = vmov 1983009808   ;;  %v4052_v7 = vmov 0   ;;  %s4053_s9 = smov 19   ;;  %s4054_s10 = smov 18   ;;  %vm87_vm0 = vcmask 154624   ;;  %s4789_s0 = inlined_call_operand.vmem [shape: bf16[4,1024], index: 0, kind: input, shape index: {}]   ;;  %s4790_s2 = inlined_call_operand.vmem [shape: bf16[9,8,4], index: 2, kind: input, shape index: {}]   ;;  %s4791_s1 = inlined_call_operand.vmem [shape: f32[1,768], index: 1, kind: input, shape index: {}]   ;;  %s4792_s4 = inlined_call_operand.vmem [shape: f32[8,1], index: 4, kind: input, shape index: {}]   ;;  %s4793_s3 = inlined_call_operand.vmem [shape: f32[8,1], index: 3, kind: input, shape index: {}]   ;;  %s4794_s5 = inlined_call_operand.vmem [shape: bf16[9,8,8], index: 5, kind: input, shape index: {}]   ;;  %s4795_s7 = inlined_call_operand.vmem [shape: f32[8,1], index: 7, kind: input, shape index: {}]   ;;  %s4796_s6 = inlined_call_operand.vmem [shape: f32[8,1], index: 6, kind: input, shape index: {}]   ;;  %s4797_s8 = inlined_call_operand.vmem [shape: f32[8,768], index: 8, kind: output, shape index: {}]  }
   0x1   :  { %v36_v1 = vld [vmem:[%s4789_s0] sm:$0xff]  ;;  %v42_v3 = vunpack.c.l.s4 %v4051_v2  ;;  %149 = vmatprep.mubr.bf16.mxu0 %v4052_v7  ;;  %1999 = vst [vmem:[#allocation2] sm:$0xf] %v4052_v7  ;;  %2000 = vst [vmem:[#allocation2 + $0x1c] sm:$0xf] %v4052_v7  ;;  %4021 = vset.pattern.permute.xlu0 %v4052_v7  ;;  %s4055_s15 = smov 17  }
   0x2   :  { %v4109_v4 = vshrl.u32 %v44_v0, 7  ;;  %v40_v6 = vcombine.high %v36_v1, %v36_v1  ;;  %4022 = vset.pattern.permute.xlu1 %v4052_v7  ;;  %2122 = vmatprep.mubr.bf16.mxu1 %v4052_v7  ;;  %v37_v11 = vld [vmem:[%s4789_s0 + $0x8] sm:$0x3f]  ;;  %s4056_s16 = smov 1   ;;  %s4057_s23 = smov 127   ;;  %vm98_vm1 = vcmask 1041408  }
   0x3   :  { %v43_v5 = vunpack.c.0.s8 %v42_v3  ;;  %v57_v16 = vcombine.high %v37_v11, %v37_v11  ;;  %v414_v18 = vld [vmem:[%s4789_s0 + $0x8] sm:$0x3f]  ;;  %s4058_s24 = smov 111   ;;  %s4059_s29 = smov 110   ;;  %v35_v3 = vld [vmem:[%s4790_s2] sm:$0xf] }
   0x4   :  { %v434_v20 = vcombine.high %v414_v18, %v414_v18  ;;  %v624_v23 = vld [vmem:[%s4789_s0 + $0x8] sm:$0x3f]  ;;  %s4060_s30 = smov 109   ;;  %vm94_vm2 = vcmask 31744   ;;  %vm464_vm3 = vcmask 146432   ;;  %vm674_vm4 = vcmask 138240  }
   0x5   :  { %v4116_v8 = vsub.s32 %v43_v5, %v4109_v4  ;;  %v644_v26 = vcombine.high %v624_v23, %v624_v23  ;;  %v834_v28 = vld [vmem:[%s4789_s0 + $0x8] sm:$0x3f]  ;;  %vm884_vm5 = vcmask 7168   ;;  %vm1094_vm6 = vcmask 1039360  }
   0x6   :  { %v854_v30 = vcombine.high %v834_v28, %v834_v28  ;;  %v1043_v31 = vld [vmem:[%s4789_s0 + $0x2] sm:$0xff]  ;;  %v1044_v38 = vld [vmem:[%s4789_s0 + $0xa] sm:$0x3f]  ;;  %vm1304_vm7 = vcmask 908288   ;;  %vm1514_vm8 = vcmask 900096   ;;  %vm1724_vm9 = vcmask 891904  }
   0x7   :  { %v47_v9 = vrot.slane %v36_v1, %v4116_v8  ;;  %v54_v10 = vrot.slane %v40_v6, %v4116_v8  ;;  %v64_v14 = vrot.slane %v37_v11, %v4116_v8  ;;  %v71_v17 = vrot.slane %v57_v16, %v4116_v8  ;;  %v1254_v44 = vld [vmem:[%s4789_s0 + $0xa] sm:$0x3f]  ;;  %v3674_v16 = vld [vmem:[%s4790_s2 + $0x10] sm:$0xf] }
   0x8   :  { %v441_v19 = vrot.slane %v414_v18, %v4116_v8  ;;  %v448_v22 = vrot.slane %v434_v20, %v4116_v8  ;;  %v651_v24 = vrot.slane %v624_v23, %v4116_v8  ;;  %v658_v27 = vrot.slane %v644_v26, %v4116_v8  ;;  %v1464_v49 = vld [vmem:[%s4789_s0 + $0xa] sm:$0x3f] }
   0x9   :  { %73 = vrot.lane.b32.xlu0 %v47_v9, %s4053_s9  ;;  %v55_v12 = vcombine.high %v47_v9, %v47_v9  ;;  %77 = vrot.lane.b32.xlu1 %v54_v10, %s4053_s9  ;;  %v56_v13 = vcombine.high %v54_v10, %v54_v10  ;;  %v72_v15 = vcombine.high %v64_v14, %v64_v14  ;;  %v1674_v54 = vld [vmem:[%s4789_s0 + $0xa] sm:$0x3f]  ;;  %vm2071_vm10 = vcmask 1043456  }
   0xa   :  { %v449_v21 = vcombine.high %v441_v19, %v441_v19  ;;  %v659_v25 = vcombine.high %v651_v24, %v651_v24  ;;  %v861_v29 = vrot.slane %v834_v28, %v4116_v8  ;;  %v868_v33 = vrot.slane %v854_v30, %v4116_v8 }
   0xb   :  { %v4172_v34 = vrot.slane %v1043_v31, %v4116_v8  ;;  %v1047_v35 = vcombine.high %v1043_v31, %v1043_v31  ;;  %v1071_v40 = vrot.slane %v1044_v38, %v4116_v8  ;;  %v1064_v42 = vcombine.high %v1044_v38, %v1044_v38 }
   0xc   :  { %v869_v32 = vcombine.high %v861_v29, %v861_v29  ;;  %v1281_v45 = vrot.slane %v1254_v44, %v4116_v8  ;;  %v1274_v46 = vcombine.high %v1254_v44, %v1254_v44  ;;  %v1491_v50 = vrot.slane %v1464_v49, %v4116_v8 }
   0xd   :  { %75 = vrot.lane.b32.xlu0 %v55_v12, %s4053_s9  ;;  %79 = vrot.lane.b32.xlu1 %v56_v13, %s4053_s9  ;;  %v4178_v36 = vcombine.high %v4172_v34, %v4172_v34  ;;  %v4181_v37 = vrot.slane %v1047_v35, %v4116_v8  ;;  %v1079_v41 = vcombine.high %v1071_v40, %v1071_v40  ;;  %vm2067_vm11 = vcmask 64512  }
   0xe   :  { %v1078_v43 = vrot.slane %v1064_v42, %v4116_v8  ;;  %v1289_v47 = vcombine.high %v1281_v45, %v1281_v45  ;;  %v1288_v48 = vrot.slane %v1274_v46, %v4116_v8  ;;  %v1499_v51 = vcombine.high %v1491_v50, %v1491_v50 }
   0xf   :  { %v4192_v39 = vcombine.high %v4181_v37, %v4181_v37  ;;  %v1484_v52 = vcombine.high %v1464_v49, %v1464_v49  ;;  %v1701_v55 = vrot.slane %v1674_v54, %v4116_v8  ;;  %v1694_v56 = vcombine.high %v1674_v54, %v1674_v54  ;;  %v3695_v49 = vld [vmem:[%s4790_s2 + $0x8] sm:$0xf] }
  0x11   :  { %81 = vrot.lane.b32.xlu0 %v64_v14, %s4053_s9  ;;  %83 = vrot.lane.b32.xlu1 %v72_v15, %s4053_s9  ;;  %v1498_v53 = vrot.slane %v1484_v52, %v4116_v8  ;;  %v1709_v57 = vcombine.high %v1701_v55, %v1701_v55  ;;  %v1708_v58 = vrot.slane %v1694_v56, %v4116_v8  ;;  %v271_v14 = vsel %vm98_vm1, %v4172_v34, 0  ;;  %v3681_v15 = vld.sshfl [vmem:[%s4789_s0 + $0xa] sm:$0x33 pattern:$0x76325410] }
  0x15   :  { %85 = vrot.lane.b32.xlu0 %v71_v17, %s4053_s9  ;;  %450 = vrot.lane.b32.xlu1 %v47_v9, %s4054_s10  ;;  %v277_v17 = vsel %vm98_vm1, %v4181_v37, 0 }
  0x19   :  { %452 = vrot.lane.b32.xlu0 %v55_v12, %s4054_s10  ;;  %454 = vrot.lane.b32.xlu1 %v54_v10, %s4054_s10 }
  0x1d   :  { %456 = vrot.lane.b32.xlu0 %v56_v13, %s4054_s10  ;;  %458 = vrot.lane.b32.xlu1 %v441_v19, %s4054_s10  ;;  %v266_v19 = vcombine.high %v3681_v15, %v3681_v15 }
  0x21   :  { %460 = vrot.lane.b32.xlu0 %v449_v21, %s4054_s10  ;;  %462 = vrot.lane.b32.xlu1 %v448_v22, %s4054_s10  ;;  %v283_v22 = vsel %vm98_vm1, %v3681_v15, 0 }
  0x25   :  { %660 = vrot.lane.b32.xlu0 %v47_v9, %s4055_s15  ;;  %662 = vrot.lane.b32.xlu1 %v55_v12, %s4055_s15 }
  0x29   :  { %664 = vrot.lane.b32.xlu0 %v54_v10, %s4055_s15  ;;  %666 = vrot.lane.b32.xlu1 %v56_v13, %s4055_s15 }
  0x2d   :  { %668 = vrot.lane.b32.xlu0 %v651_v24, %s4055_s15  ;;  %670 = vrot.lane.b32.xlu1 %v659_v25, %s4055_s15 }
  0x31   :  { %672 = vrot.lane.b32.xlu0 %v658_v27, %s4055_s15  ;;  %870 = vrot.lane.b32.xlu1 %v47_v9, %s4056_s16 }
  0x35   :  { %872 = vrot.lane.b32.xlu0 %v55_v12, %s4056_s16  ;;  %874 = vrot.lane.b32.xlu1 %v54_v10, %s4056_s16 }
  0x39   :  { %876 = vrot.lane.b32.xlu0 %v56_v13, %s4056_s16  ;;  %878 = vrot.lane.b32.xlu1 %v861_v29, %s4056_s16 }
  0x3d   :  { %880 = vrot.lane.b32.xlu0 %v869_v32, %s4056_s16  ;;  %882 = vrot.lane.b32.xlu1 %v868_v33, %s4056_s16  ;;  %v3688_v32 = vld [vmem:[%s4790_s2 + $0x4] sm:$0xf] }
  0x41   :  { %1080 = vrot.lane.b32.xlu0 %v4172_v34, %s4057_s23  ;;  %1082 = vrot.lane.b32.xlu1 %v4178_v36, %s4057_s23 }
  0x45   :  { %1084 = vrot.lane.b32.xlu0 %v4181_v37, %s4057_s23  ;;  %1086 = vrot.lane.b32.xlu1 %v4192_v39, %s4057_s23 }
  0x49   :  { %1088 = vrot.lane.b32.xlu0 %v1071_v40, %s4057_s23  ;;  %1090 = vrot.lane.b32.xlu1 %v1079_v41, %s4057_s23 }
  0x4d   :  { %1092 = vrot.lane.b32.xlu0 %v1078_v43, %s4057_s23  ;;  %1290 = vrot.lane.b32.xlu1 %v4172_v34, %s4058_s24 }
  0x51   :  { %1292 = vrot.lane.b32.xlu0 %v4178_v36, %s4058_s24  ;;  %1294 = vrot.lane.b32.xlu1 %v4181_v37, %s4058_s24 }
  0x55   :  { %1296 = vrot.lane.b32.xlu0 %v4192_v39, %s4058_s24  ;;  %1298 = vrot.lane.b32.xlu1 %v1281_v45, %s4058_s24 }
  0x59   :  { %1300 = vrot.lane.b32.xlu0 %v1289_v47, %s4058_s24  ;;  %1302 = vrot.lane.b32.xlu1 %v1288_v48, %s4058_s24 }
  0x5d   :  { %1500 = vrot.lane.b32.xlu0 %v4172_v34, %s4059_s29  ;;  %1502 = vrot.lane.b32.xlu1 %v4178_v36, %s4059_s29 }
  0x61   :  { %1504 = vrot.lane.b32.xlu0 %v4181_v37, %s4059_s29  ;;  %1506 = vrot.lane.b32.xlu1 %v4192_v39, %s4059_s29 }
  0x65   :  { %1508 = vrot.lane.b32.xlu0 %v1491_v50, %s4059_s29  ;;  %1510 = vrot.lane.b32.xlu1 %v1499_v51, %s4059_s29 }
  0x69   :  { %1512 = vrot.lane.b32.xlu0 %v1498_v53, %s4059_s29  ;;  %1710 = vrot.lane.b32.xlu1 %v4172_v34, %s4060_s30 }
  0x6d   :  { %1712 = vrot.lane.b32.xlu0 %v4178_v36, %s4060_s30  ;;  %1714 = vrot.lane.b32.xlu1 %v4181_v37, %s4060_s30 }
  0x71   :  { %1716 = vrot.lane.b32.xlu0 %v4192_v39, %s4060_s30  ;;  %1718 = vrot.lane.b32.xlu1 %v1701_v55, %s4060_s30 }
  0x75   :  { %1720 = vrot.lane.b32.xlu0 %v1709_v57, %s4060_s30  ;;  %1722 = vrot.lane.b32.xlu1 %v1708_v58, %s4060_s30 }
  0x7b   :  { %v74_v59 = vpop.permute.xlu0 %73  ;;  %v78_v60 = vpop.permute.xlu1 %77 }
  0x7f   :  { %v76_v61 = vpop.permute.xlu0 %75  ;;  %v80_v62 = vpop.permute.xlu1 %79 }
  0x80   :  { %v89_v63 = vsel %vm87_vm0, %v76_v61, %v78_v60  ;;  %v88_v0 = vsel %vm87_vm0, %v74_v59, %v76_v61  ;;  %v90_v2 = vsel %vm87_vm0, %v78_v60, %v80_v62 }
  0x81   :  { %3675 = vmatprep.subr.msk.bf16.mxu0 %vm98_vm1, %v89_v63  ;;  %v100_v1 = vsel %vm98_vm1, %v88_v0, 0  ;;  %v106_v8 = vsel %vm98_vm1, %v90_v2, 0  ;;  %v3702_v2 = vld [vmem:[%s4790_s2 + $0xc] sm:$0xf] }
  0x82   :  { %118 = vmatpush1.bf16.msra.mxu0 %v100_v1 }
  0x83   :  { %v82_v5 = vpop.permute.xlu0 %81  ;;  %v84_v9 = vpop.permute.xlu1 %83 }
  0x84   :  { %v91_v6 = vsel %vm87_vm0, %v80_v62, %v82_v5  ;;  %v92_v12 = vsel %vm87_vm0, %v82_v5, %v84_v9 }
  0x85   :  { %3676 = vmatmul.mubr.msk.bf16.vlgmr.msra.gmra.mrb[0].mxu0 %vm94_vm2, %v35_v3  ;;  %3677 = vmatprep.subr.msk.bf16.mxu0 %vm98_vm1, %v91_v6  ;;  %v112_v13 = vsel %vm98_vm1, %v92_v12, 0 }
  0x86   :  { %159 = vmatpush1.bf16.msra.mxu0 %v106_v8  ;;  %190 = vmatprep.mubr.bf16.mxu0 %v4052_v7 }
  0x87   :  { %v86_v10 = vpop.permute.xlu0 %85  ;;  %v451_v18 = vpop.permute.xlu1 %450 }
  0x88   :  { %v93_v11 = vsel %vm87_vm0, %v84_v9, %v86_v10 }
  0x89   :  { %3679 = vmatprep.subr.msk.bf16.mxu0 %vm98_vm1, %v93_v11 }
  0x8b   :  { %v453_v20 = vpop.permute.xlu0 %452  ;;  %v455_v21 = vpop.permute.xlu1 %454 }
  0x8c   :  { %v466_v23 = vsel %vm464_vm3, %v453_v20, %v455_v21  ;;  %v465_v24 = vsel %vm464_vm3, %v451_v18, %v453_v20 }
  0x8d   :  { %3678 = vmatmul.mubr.msk.bf16.vlgmr.msra.gmra.mrb[4].mxu0 %vm94_vm2, %v35_v3  ;;  %v475_v26 = vsel %vm98_vm1, %v465_v24, 0 }
  0x8e   :  { %200 = vmatpush1.bf16.msra.mxu0 %v112_v13  ;;  %231 = vmatprep.mubr.bf16.mxu0 %v4052_v7 }
  0x8f   :  { %3682 = vmatprep.subr.msk.bf16.mxu0 %vm98_vm1, %v4178_v36  ;;  %v459_v25 = vpop.permute.xlu1 %458  ;;  %v457_v27 = vpop.permute.xlu0 %456 }
  0x90   :  { %v468_v28 = vsel %vm464_vm3, %v457_v27, %v459_v25  ;;  %v467_v31 = vsel %vm464_vm3, %v455_v21, %v457_v27  ;;  %v3709_v21 = vld [vmem:[%s4790_s2 + $0x14] sm:$0xf] }
  0x91   :  { %v481_v35 = vsel %vm98_vm1, %v467_v31, 0 }
  0x93   :  { %v461_v29 = vpop.permute.xlu0 %460  ;;  %v463_v30 = vpop.permute.xlu1 %462 }
  0x94   :  { %v470_v34 = vsel %vm464_vm3, %v461_v29, %v463_v30  ;;  %v469_v38 = vsel %vm464_vm3, %v459_v25, %v461_v29 }
  0x95   :  { %3680 = vmatmul.mubr.msk.bf16.vlgmr.msra.gmra.mrb[8].mxu0 %vm94_vm2, %v35_v3  ;;  %v487_v40 = vsel %vm98_vm1, %v469_v38, 0  ;;  %v3716_v38 = vld [vmem:[%s4790_s2 + $0x18] sm:$0xf] }
  0x96   :  { %289 = vmatpush1.bf16.msra.mxu0 %v271_v14  ;;  %320 = vmatprep.mubr.bf16.mxu0 %v4052_v7 }
  0x97   :  { %3684 = vmatprep.subr.msk.bf16.mxu0 %vm98_vm1, %v4192_v39  ;;  %v661_v33 = vpop.permute.xlu0 %660  ;;  %v663_v37 = vpop.permute.xlu1 %662 }
  0x98   :  { %v675_v41 = vsel %vm674_vm4, %v661_v33, %v663_v37 }
  0x99   :  { %v685_v43 = vsel %vm98_vm1, %v675_v41, 0 }
  0x9b   :  { %v665_v36 = vpop.permute.xlu0 %664  ;;  %v667_v44 = vpop.permute.xlu1 %666 }
  0x9c   :  { %v676_v39 = vsel %vm674_vm4, %v663_v37, %v665_v36  ;;  %v677_v48 = vsel %vm674_vm4, %v665_v36, %v667_v44 }
  0x9d   :  { %3683 = vmatmul.mubr.msk.bf16.vlgmr.msra.gmra.mrb[0].mxu0 %vm94_vm2, %v3674_v16  ;;  %v691_v52 = vsel %vm98_vm1, %v677_v48, 0 }
  0x9e   :  { %330 = vmatpush1.bf16.msra.mxu0 %v277_v17  ;;  %361 = vmatprep.mubr.bf16.mxu0 %v4052_v7 }
  0x9f   :  { %3686 = vmatprep.subr.msk.bf16.mxu0 %vm98_vm1, %v266_v19  ;;  %v669_v42 = vpop.permute.xlu0 %668  ;;  %v671_v46 = vpop.permute.xlu1 %670 }
  0xa0   :  { %v678_v45 = vsel %vm674_vm4, %v667_v44, %v669_v42  ;;  %v679_v55 = vsel %vm674_vm4, %v669_v42, %v671_v46 }
  0xa1   :  { %v697_v57 = vsel %vm98_vm1, %v679_v55, 0  ;;  %v3723_v55 = vld [vmem:[%s4790_s2 + $0x1c] sm:$0xf] }
  0xa3   :  { %v673_v47 = vpop.permute.xlu0 %672  ;;  %v871_v50 = vpop.permute.xlu1 %870 }
  0xa4   :  { %v680_v51 = vsel %vm674_vm4, %v671_v46, %v673_v47 }
  0xa5   :  { %3685 = vmatmul.mubr.msk.bf16.vlgmr.msra.gmra.mrb[4].mxu0 %vm94_vm2, %v3674_v16 }
  0xa6   :  { %371 = vmatpush1.bf16.msra.mxu0 %v283_v22  ;;  %402 = vmatprep.mubr.bf16.mxu0 %v4052_v7 }
  0xa7   :  { %3689 = vmatprep.subr.msk.bf16.mxu0 %vm98_vm1, %v466_v23  ;;  %v873_v53 = vpop.permute.xlu0 %872  ;;  %v875_v54 = vpop.permute.xlu1 %874 }
  0xa8   :  { %v886_v56 = vsel %vm884_vm5, %v873_v53, %v875_v54  ;;  %v885_v58 = vsel %vm884_vm5, %v871_v50, %v873_v53 }
  0xa9   :  { %v895_v60 = vsel %vm98_vm1, %v885_v58, 0 }
  0xab   :  { %v879_v59 = vpop.permute.xlu1 %878  ;;  %v877_v61 = vpop.permute.xlu0 %876 }
  0xac   :  { %v888_v62 = vsel %vm884_vm5, %v877_v61, %v879_v59  ;;  %v887_v1 = vsel %vm884_vm5, %v875_v54, %v877_v61 }
  0xad   :  { %3687 = vmatmul.mubr.msk.bf16.vlgmr.msra.gmra.mrb[8].mxu0 %vm94_vm2, %v3674_v16  ;;  %v901_v6 = vsel %vm98_vm1, %v887_v1, 0 }
  0xae   :  { %493 = vmatpush1.bf16.msra.mxu0 %v475_v26  ;;  %524 = vmatprep.mubr.bf16.mxu0 %v4052_v7 }
  0xaf   :  { %3691 = vmatprep.subr.msk.bf16.mxu0 %vm98_vm1, %v468_v28  ;;  %v881_v63 = vpop.permute.xlu0 %880  ;;  %v883_v0 = vpop.permute.xlu1 %882 }
  0xb0   :  { %v890_v5 = vsel %vm884_vm5, %v881_v63, %v883_v0  ;;  %v889_v10 = vsel %vm884_vm5, %v879_v59, %v881_v63 }
  0xb1   :  { %v907_v12 = vsel %vm98_vm1, %v889_v10, 0 }
  0xb3   :  { %v1081_v3 = vpop.permute.xlu0 %1080  ;;  %v1083_v9 = vpop.permute.xlu1 %1082 }
  0xb4   :  { %v1095_v13 = vsel %vm1094_vm6, %v1081_v3, %v1083_v9 }
  0xb5   :  { %3690 = vmatmul.mubr.msk.bf16.vlgmr.msra.gmra.mrb[0].mxu0 %vm94_vm2, %v3688_v32  ;;  %v1105_v15 = vsel %vm98_vm1, %v1095_v13, 0 }
  0xb6   :  { %534 = vmatpush1.bf16.msra.mxu0 %v481_v35  ;;  %565 = vmatprep.mubr.bf16.mxu0 %v4052_v7 }
  0xb7   :  { %3693 = vmatprep.subr.msk.bf16.mxu0 %vm98_vm1, %v470_v34  ;;  %v1085_v8 = vpop.permute.xlu0 %1084  ;;  %v1087_v16 = vpop.permute.xlu1 %1086 }
  0xb8   :  { %v1096_v11 = vsel %vm1094_vm6, %v1083_v9, %v1085_v8  ;;  %v1097_v20 = vsel %vm1094_vm6, %v1085_v8, %v1087_v16  ;;  %v3730_v9 = vld [vmem:[%s4790_s2 + $0x20] sm:$0xf] }
  0xb9   :  { %v1111_v24 = vsel %vm98_vm1, %v1097_v20, 0 }
  0xbb   :  { %v1089_v14 = vpop.permute.xlu0 %1088  ;;  %v1091_v18 = vpop.permute.xlu1 %1090 }
  0xbc   :  { %v1098_v17 = vsel %vm1094_vm6, %v1087_v16, %v1089_v14  ;;  %v1099_v27 = vsel %vm1094_vm6, %v1089_v14, %v1091_v18  ;;  %v30_v16 = vld [vmem:[%s4791_s1] sm:$0x3f] }
  0xbd   :  { %3692 = vmatmul.mubr.msk.bf16.vlgmr.msra.gmra.mrb[4].mxu0 %vm94_vm2, %v3688_v32  ;;  %v1117_v29 = vsel %vm98_vm1, %v1099_v27, 0 }
  0xbe   :  { %575 = vmatpush1.bf16.msra.mxu0 %v487_v40  ;;  %606 = vmatprep.mubr.bf16.mxu0 %v4052_v7 }
  0xbf   :  { %3696 = vmatprep.subr.msk.bf16.mxu0 %vm98_vm1, %v676_v39  ;;  %v1093_v19 = vpop.permute.xlu0 %1092  ;;  %v1291_v22 = vpop.permute.xlu1 %1290 }
  0xc0   :  { %v1100_v23 = vsel %vm1094_vm6, %v1091_v18, %v1093_v19 }
  0xc3   :  { %v1293_v25 = vpop.permute.xlu0 %1292  ;;  %v1295_v26 = vpop.permute.xlu1 %1294 }
  0xc4   :  { %v1306_v28 = vsel %vm1304_vm7, %v1293_v25, %v1295_v26  ;;  %v1305_v30 = vsel %vm1304_vm7, %v1291_v22, %v1293_v25 }
  0xc5   :  { %3694 = vmatmul.mubr.msk.bf16.vlgmr.msra.gmra.mrb[8].mxu0 %vm94_vm2, %v3688_v32  ;;  %v1315_v32 = vsel %vm98_vm1, %v1305_v30, 0 }
  0xc6   :  { %703 = vmatpush1.bf16.msra.mxu0 %v685_v43  ;;  %734 = vmatprep.mubr.bf16.mxu0 %v4052_v7 }
  0xc7   :  { %3698 = vmatprep.subr.msk.bf16.mxu0 %vm98_vm1, %v678_v45  ;;  %v1299_v31 = vpop.permute.xlu1 %1298  ;;  %v1297_v33 = vpop.permute.xlu0 %1296 }
  0xc8   :  { %v1308_v34 = vsel %vm1304_vm7, %v1297_v33, %v1299_v31  ;;  %v1307_v37 = vsel %vm1304_vm7, %v1295_v26, %v1297_v33  ;;  %v1896_v26 = vsub.s32 3, %v4109_v4 }
  0xc9   :  { %v1321_v41 = vsel %vm98_vm1, %v1307_v37, 0  ;;  %v1900_v37 = vsub.s32 4, %v4109_v4 }
  0xca   :  { %v4461_v33 = vrot.slane %v30_v16, %v1896_v26 }
  0xcb   :  { %v1301_v35 = vpop.permute.xlu0 %1300  ;;  %v1303_v36 = vpop.permute.xlu1 %1302 }
  0xcc   :  { %v1310_v40 = vsel %vm1304_vm7, %v1301_v35, %v1303_v36  ;;  %v1309_v44 = vsel %vm1304_vm7, %v1299_v31, %v1301_v35 }
  0xcd   :  { %3697 = vmatmul.mubr.msk.bf16.vlgmr.msra.gmra.mrb[0].mxu0 %vm94_vm2, %v3695_v49  ;;  %v1327_v46 = vsel %vm98_vm1, %v1309_v44, 0 }
  0xce   :  { %744 = vmatpush1.bf16.msra.mxu0 %v691_v52  ;;  %775 = vmatprep.mubr.bf16.mxu0 %v4052_v7 }
  0xcf   :  { %3700 = vmatprep.subr.msk.bf16.mxu0 %vm98_vm1, %v680_v51  ;;  %v1501_v39 = vpop.permute.xlu0 %1500  ;;  %v1503_v43 = vpop.permute.xlu1 %1502 }
  0xd0   :  { %v1515_v47 = vsel %vm1514_vm8, %v1501_v39, %v1503_v43 }
  0xd3   :  { %v1505_v42 = vpop.permute.xlu0 %1504  ;;  %v1507_v50 = vpop.permute.xlu1 %1506 }
  0xd4   :  { %v1516_v45 = vsel %vm1514_vm8, %v1503_v43, %v1505_v42  ;;  %v1517_v54 = vsel %vm1514_vm8, %v1505_v42, %v1507_v50 }
  0xd5   :  { %3699 = vmatmul.mubr.msk.bf16.vlgmr.msra.gmra.mrb[4].mxu0 %vm94_vm2, %v3695_v49  ;;  %v1531_v58 = vsel %vm98_vm1, %v1517_v54, 0 }
  0xd6   :  { %785 = vmatpush1.bf16.msra.mxu0 %v697_v57  ;;  %816 = vmatprep.mubr.bf16.mxu0 %v4052_v7 }
  0xd7   :  { %3703 = vmatprep.subr.msk.bf16.mxu0 %vm98_vm1, %v886_v56  ;;  %v1509_v48 = vpop.permute.xlu0 %1508  ;;  %v1511_v52 = vpop.permute.xlu1 %1510 }
  0xd8   :  { %v1518_v51 = vsel %vm1514_vm8, %v1507_v50, %v1509_v48  ;;  %v1519_v61 = vsel %vm1514_vm8, %v1509_v48, %v1511_v52 }
  0xd9   :  { %v1537_v63 = vsel %vm98_vm1, %v1519_v61, 0  ;;  %v1969_v61 = vld [vmem:[%s4792_s4] sm:$0xff] }
  0xdb   :  { %v1513_v53 = vpop.permute.xlu0 %1512  ;;  %v1711_v56 = vpop.permute.xlu1 %1710 }
  0xdc   :  { %v1520_v57 = vsel %vm1514_vm8, %v1511_v52, %v1513_v53 }
  0xdd   :  { %3701 = vmatmul.mubr.msk.bf16.vlgmr.msra.gmra.mrb[8].mxu0 %vm94_vm2, %v3695_v49  ;;  %v1525_v49 = vsel %vm98_vm1, %v1515_v47, 0  ;;  %v4467_v47 = vrot.slane %v30_v16, %v1900_v37 }
  0xde   :  { %913 = vmatpush1.bf16.msra.mxu0 %v895_v60  ;;  %944 = vmatprep.mubr.bf16.mxu0 %v4052_v7 }
  0xdf   :  { %3705 = vmatprep.subr.msk.bf16.mxu0 %vm98_vm1, %v888_v62  ;;  %v1713_v59 = vpop.permute.xlu0 %1712  ;;  %v1715_v60 = vpop.permute.xlu1 %1714 }
  0xe0   :  { %v1726_v62 = vsel %vm1724_vm9, %v1713_v59, %v1715_v60  ;;  %v1725_v0 = vsel %vm1724_vm9, %v1711_v56, %v1713_v59 }
  0xe3   :  { %v1719_v1 = vpop.permute.xlu1 %1718  ;;  %v1717_v3 = vpop.permute.xlu0 %1716 }
  0xe4   :  { %v1727_v8 = vsel %vm1724_vm9, %v1715_v60, %v1717_v3 }
  0xe5   :  { %3704 = vmatmul.mubr.msk.bf16.vlgmr.msra.gmra.mrb[0].mxu0 %vm94_vm2, %v3702_v2 }
  0xe6   :  { %954 = vmatpush1.bf16.msra.mxu0 %v901_v6  ;;  %985 = vmatprep.mubr.bf16.mxu0 %v4052_v7 }
  0xe7   :  { %3707 = vmatprep.subr.msk.bf16.mxu0 %vm98_vm1, %v890_v5  ;;  %v1728_v5 = vsel %vm1724_vm9, %v1717_v3, %v1719_v1  ;;  %v1723_v6 = vpop.permute.xlu1 %1722  ;;  %v1721_v10 = vpop.permute.xlu0 %1720 }
  0xe8   :  { %v1729_v13 = vsel %vm1724_vm9, %v1719_v1, %v1721_v10 }
  0xe9   :  { %v1747_v14 = vsel %vm98_vm1, %v1729_v13, 0 }
  0xed   :  { %3706 = vmatmul.mubr.msk.bf16.vlgmr.msra.gmra.mrb[4].mxu0 %vm94_vm2, %v3702_v2 }
  0xee   :  { %995 = vmatpush1.bf16.msra.mxu0 %v907_v12  ;;  %1026 = vmatprep.mubr.bf16.mxu0 %v4052_v7  ;;  %v1741_v12 = vsel %vm98_vm1, %v1727_v8, 0 }
  0xef   :  { %3710 = vmatprep.subr.msk.bf16.mxu0 %vm98_vm1, %v1096_v11  ;;  %v1730_v11 = vsel %vm1724_vm9, %v1721_v10, %v1723_v6 }
  0xf5   :  { %3708 = vmatmul.mubr.msk.bf16.vlgmr.msra.gmra.mrb[8].mxu0 %vm94_vm2, %v3702_v2  ;;  %v1735_v2 = vsel %vm98_vm1, %v1725_v0, 0 }
  0xf6   :  { %1123 = vmatpush1.bf16.msra.mxu0 %v1105_v15  ;;  %1154 = vmatprep.mubr.bf16.mxu0 %v4052_v7  ;;  %v1884_v15 = vsub.s32 0, %v4109_v4 }
  0xf7   :  { %3712 = vmatprep.subr.msk.bf16.mxu0 %vm98_vm1, %v1098_v17  ;;  %v1888_v17 = vsub.s32 1, %v4109_v4 }
  0xf8   :  { %v4445_v18 = vrot.slane %v30_v16, %v1884_v15 }
  0xf9   :  { %v4447_v19 = vrot.slane %v30_v16, %v1888_v17 }
  0xfd   :  { %3711 = vmatmul.mubr.msk.bf16.vlgmr.msra.gmra.mrb[0].mxu0 %vm94_vm2, %v3709_v21 }
  0xfe   :  { %1164 = vmatpush1.bf16.msra.mxu0 %v1111_v24  ;;  %1195 = vmatprep.mubr.bf16.mxu0 %v4052_v7 }
  0xff   :  { %3714 = vmatprep.subr.msk.bf16.mxu0 %vm98_vm1, %v1100_v23  ;;  %v1892_v23 = vsub.s32 2, %v4109_v4 }
 0x101   :  { %v4459_v31 = vrot.slane %v30_v16, %v1892_v23 }
 0x105   :  { %3713 = vmatmul.mubr.msk.bf16.vlgmr.msra.gmra.mrb[4].mxu0 %vm94_vm2, %v3709_v21 }
 0x106   :  { %1205 = vmatpush1.bf16.msra.mxu0 %v1117_v29  ;;  %1236 = vmatprep.mubr.bf16.mxu0 %v4052_v7 }
 0x107   :  { %3717 = vmatprep.subr.msk.bf16.mxu0 %vm98_vm1, %v1306_v28 }
 0x10d   :  { %3715 = vmatmul.mubr.msk.bf16.vlgmr.msra.gmra.mrb[8].mxu0 %vm94_vm2, %v3709_v21 }
 0x10e   :  { %1333 = vmatpush1.bf16.msra.mxu0 %v1315_v32  ;;  %1364 = vmatprep.mubr.bf16.mxu0 %v4052_v7 }
 0x10f   :  { %3719 = vmatprep.subr.msk.bf16.mxu0 %vm98_vm1, %v1308_v34 }
 0x115   :  { %3718 = vmatmul.mubr.msk.bf16.vlgmr.msra.gmra.mrb[0].mxu0 %vm94_vm2, %v3716_v38 }
 0x116   :  { %1374 = vmatpush1.bf16.msra.mxu0 %v1321_v41  ;;  %1405 = vmatprep.mubr.bf16.mxu0 %v4052_v7 }
 0x117   :  { %3721 = vmatprep.subr.msk.bf16.mxu0 %vm98_vm1, %v1310_v40  ;;  %v1904_v40 = vsub.s32 5, %v4109_v4 }
 0x119   :  { %v4469_v48 = vrot.slane %v30_v16, %v1904_v40 }
 0x11d   :  { %3720 = vmatmul.mubr.msk.bf16.vlgmr.msra.gmra.mrb[4].mxu0 %vm94_vm2, %v3716_v38 }
 0x11e   :  { %1415 = vmatpush1.bf16.msra.mxu0 %v1327_v46  ;;  %1446 = vmatprep.mubr.bf16.mxu0 %v4052_v7 }
 0x11f   :  { %3724 = vmatprep.subr.msk.bf16.mxu0 %vm98_vm1, %v1516_v45 }
 0x125   :  { %3722 = vmatmul.mubr.msk.bf16.vlgmr.msra.gmra.mrb[8].mxu0 %vm94_vm2, %v3716_v38 }
 0x126   :  { %1543 = vmatpush1.bf16.msra.mxu0 %v1525_v49  ;;  %1574 = vmatprep.mubr.bf16.mxu0 %v4052_v7 }
 0x127   :  { %3726 = vmatprep.subr.msk.bf16.mxu0 %vm98_vm1, %v1518_v51 }
 0x12d   :  { %3725 = vmatmul.mubr.msk.bf16.vlgmr.msra.gmra.mrb[0].mxu0 %vm94_vm2, %v3723_v55 }
 0x12e   :  { %1584 = vmatpush1.bf16.msra.mxu0 %v1531_v58  ;;  %1615 = vmatprep.mubr.bf16.mxu0 %v4052_v7 }
 0x12f   :  { %3728 = vmatprep.subr.msk.bf16.mxu0 %vm98_vm1, %v1520_v57 }
 0x135   :  { %3727 = vmatmul.mubr.msk.bf16.vlgmr.msra.gmra.mrb[4].mxu0 %vm94_vm2, %v3723_v55 }
 0x136   :  { %1625 = vmatpush1.bf16.msra.mxu0 %v1537_v63  ;;  %1656 = vmatprep.mubr.bf16.mxu0 %v4052_v7 }
 0x137   :  { %3731 = vmatprep.subr.msk.bf16.mxu0 %vm98_vm1, %v1726_v62  ;;  %v1957_v62 = vld [vmem:[%s4793_s3] sm:$0xff] }
 0x13d   :  { %3729 = vmatmul.mubr.msk.bf16.vlgmr.msra.gmra.mrb[8].mxu0 %vm94_vm2, %v3723_v55 }
 0x13e   :  { %1753 = vmatpush1.bf16.msra.mxu0 %v1735_v2  ;;  %1784 = vmatprep.mubr.bf16.mxu0 %v4052_v7 }
 0x13f   :  { %3733 = vmatprep.subr.msk.bf16.mxu0 %vm98_vm1, %v1728_v5 }
 0x145   :  { %3732 = vmatmul.mubr.msk.bf16.vlgmr.msra.gmra.mrb[0].mxu0 %vm94_vm2, %v3730_v9 }
 0x146   :  { %1794 = vmatpush1.bf16.msra.mxu0 %v1741_v12  ;;  %1825 = vmatprep.mubr.bf16.mxu0 %v4052_v7 }
 0x147   :  { %3735 = vmatprep.subr.msk.bf16.mxu0 %vm98_vm1, %v1730_v11 }
 0x14d   :  { %3734 = vmatmul.mubr.msk.bf16.vlgmr.msra.gmra.mrb[4].mxu0 %vm94_vm2, %v3730_v9 }
 0x14e   :  { %1835 = vmatpush1.bf16.msra.mxu0 %v1747_v14  ;;  %1866 = vmatprep.mubr.bf16.mxu0 %v4052_v7 }
 0x155   :  { %3736 = vmatmul.mubr.msk.bf16.vlgmr.msra.gmra.mrb[8].mxu0 %vm94_vm2, %v3730_v9 }
 0x218   :  { %v4449_v20 = vpop.f32.mrb[0].mxu0 }
 0x219   :  { %v1912_v21 = vmul.f32 %v4445_v18, %v4449_v20  ;;  %v4453_v22 = vpop.f32.mrb[1].mxu0 }
 0x21a   :  { %v1913_v24 = vmul.f32 %v4447_v19, %v4453_v22  ;;  %v1790_v25 = vpop.f32.mrb[2].mxu0 }
 0x21b   :  { %v1918_v27 = vmul.f32 %v1912_v21, %v1912_v21  ;;  %v1791_v28 = vpop.f32.mrb[3].mxu0 }
 0x21c   :  { %v1919_v29 = vmul.f32 %v1913_v24, %v1913_v24  ;;  %v1924_v30 = vadd.f32 %v1913_v24, %v1912_v21 }
 0x21e   :  { %v1931_v32 = vadd.f32 %v1919_v29, %v1918_v27 }
 0x220   :  { %v1827_v34 = vpop.f32.mrb[4].mxu0 }
 0x221   :  { %v1914_v35 = vmul.f32 %v4459_v31, %v1827_v34  ;;  %v1829_v36 = vpop.f32.mrb[5].mxu0 }
 0x222   :  { %v1915_v38 = vmul.f32 %v4461_v33, %v1829_v36  ;;  %v1831_v39 = vpop.f32.mrb[6].mxu0 }
 0x223   :  { %v1920_v41 = vmul.f32 %v1914_v35, %v1914_v35  ;;  %v1925_v42 = vadd.f32 %v1924_v30, %v1914_v35  ;;  %v1832_v43 = vpop.f32.mrb[7].mxu0 }
 0x224   :  { %v1921_v44 = vmul.f32 %v1915_v38, %v1915_v38 }
 0x225   :  { %v1932_v45 = vadd.f32 %v1931_v32, %v1920_v41  ;;  %v1926_v46 = vadd.f32 %v1925_v42, %v1915_v38 }
 0x227   :  { %v1933_v49 = vadd.f32 %v1932_v45, %v1921_v44 }
 0x228   :  { %v1868_v50 = vpop.f32.mrb[8].mxu0 }
 0x229   :  { %v1916_v51 = vmul.f32 %v4467_v47, %v1868_v50  ;;  %v1870_v52 = vpop.f32.mrb[9].mxu0 }
 0x22a   :  { %v1917_v53 = vmul.f32 %v4469_v48, %v1870_v52  ;;  %v1872_v54 = vpop.f32.mrb[10].mxu0 }
 0x22b   :  { %v1922_v55 = vmul.f32 %v1916_v51, %v1916_v51  ;;  %v1873_v4 = vpop.f32.mrb[11].mxu0  ;;  %v1927_v56 = vadd.f32 %v1926_v46, %v1916_v51 }
 0x22c   :  { %v1923_v57 = vmul.f32 %v1917_v53, %v1917_v53 }
 0x22d   :  { %v1928_v58 = vadd.f32 %v1927_v56, %v1917_v53  ;;  %v1934_v59 = vadd.f32 %v1933_v49, %v1922_v55 }
 0x22f   :  { %1929 = vadd.xlane.f32.xlu0 %v1928_v58  ;;  %v1935_v60 = vadd.f32 %v1934_v59, %v1923_v57 }
 0x231   :  { %1936 = vadd.xlane.f32.xlu1 %v1935_v60 }
 0x242   :  { %1972 = vperm.xlu1 %4022, %v1969_v61  }
 0x245   :  { %1960 = vperm.xlu0 %4021, %v1957_v62  }
 0x2bc   :  { %v1930_v63 = vpop.xlane.xlu0 %1929 }
 0x2bd   :  { %v1938_v0 = vmul.f32 0.001953125, %v1930_v63 }
 0x2be   :  { %v1937_v1 = vpop.xlane.xlu1 %1936 }
 0x2bf   :  { %v1940_v2 = vmul.f32 %v1938_v0, %v1938_v0  ;;  %v1939_v3 = vmul.f32 0.001953125, %v1937_v1  ;;  %v1943_v9 = vsub.f32 %v4449_v20, %v1938_v0  ;;  %v1944_v10 = vsub.f32 %v4453_v22, %v1938_v0 }
 0x2c0   :  { %v1945_v11 = vsub.f32 %v1827_v34, %v1938_v0  ;;  %v1946_v12 = vsub.f32 %v1829_v36, %v1938_v0  ;;  %v1947_v14 = vsub.f32 %v1868_v50, %v1938_v0  ;;  %v1948_v15 = vsub.f32 %v1870_v52, %v1938_v0 }
 0x2c1   :  { %v1941_v5 = vsub.f32 %v1939_v3, %v1940_v2 }
 0x2c2   :  { %v1973_v27 = vpop.permute.xlu1 %1972 }
 0x2c3   :  { %v1942_v6 = vmax.f32 %v1941_v5, 0.0 }
 0x2c4   :  { %v1961_v16 = vpop.permute.xlu0 %1960 }
 0x2c5   :  { %v1949_v8 = vadd.f32 1e-05, %v1942_v6  ;;  %v4040_v6 = vld [vmem:[#allocation2 + $0x1c] ss:$0 sps:$4 sm:$0xff]  }
 0x2c7   :  { %4041 = vrsqrt.f32 %v1949_v8 }
 0x2d1   :  { %v4042_v13 = vpop.eup %4041 }
 0x2d2   :  { %v1951_v17 = vmul.f32 %v4042_v13, %v1943_v9  ;;  %v1952_v21 = vmul.f32 %v4042_v13, %v1944_v10  ;;  %v1953_v23 = vmul.f32 %v4042_v13, %v1945_v11  ;;  %v1954_v24 = vmul.f32 %v4042_v13, %v1946_v12 }
 0x2d3   :  { %v1955_v25 = vmul.f32 %v4042_v13, %v1947_v14  ;;  %v1956_v26 = vmul.f32 %v4042_v13, %v1948_v15 }
 0x2d4   :  { %v1963_v28 = vmul.f32 %v1961_v16, %v1951_v17  ;;  %v1964_v29 = vmul.f32 %v1961_v16, %v1952_v21  ;;  %v1965_v30 = vmul.f32 %v1961_v16, %v1953_v23  ;;  %v1966_v32 = vmul.f32 %v1961_v16, %v1954_v24  ;;  %v2024_v17 = vld [vmem:[%s4794_s5] sm:$0xf] }
 0x2d5   :  { %v1967_v20 = vmul.f32 %v1961_v16, %v1955_v25  ;;  %v1968_v35 = vmul.f32 %v1961_v16, %v1956_v26 }
 0x2d6   :  { %v1975_v22 = vadd.f32 %v1973_v27, %v1963_v28  ;;  %v1976_v34 = vadd.f32 %v1973_v27, %v1964_v29  ;;  %v1977_v36 = vadd.f32 %v1973_v27, %v1965_v30  ;;  %v1978_v37 = vadd.f32 %v1973_v27, %v1966_v32 }
 0x2d7   :  { %v1979_v38 = vadd.f32 %v1973_v27, %v1967_v20  ;;  %v1980_v39 = vadd.f32 %v1973_v27, %v1968_v35  ;;  %v3740_v35 = vld [vmem:[%s4794_s5 + $0x10] sm:$0xf] }
 0x2d8   :  { %v1981_v40 = vmax.f32 %v1975_v22, 0.0  ;;  %v1982_v41 = vmax.f32 %v1976_v34, 0.0  ;;  %v1983_v42 = vmax.f32 %v1977_v36, 0.0  ;;  %v1984_v43 = vmax.f32 %v1978_v37, 0.0 }
 0x2d9   :  { %v1985_v44 = vmax.f32 %v1979_v38, 0.0  ;;  %v1986_v45 = vmax.f32 %v1980_v39, 0.0 }
 0x2da   :  { %v1987_v46 = vmul.f32 %v1981_v40, %v4445_v18  ;;  %v1988_v49 = vmul.f32 %v1982_v41, %v4447_v19  ;;  %v1989_v50 = vmul.f32 %v1983_v42, %v4459_v31  ;;  %v1990_v51 = vmul.f32 %v1984_v43, %v4461_v33 }
 0x2db   :  { %v1991_v52 = vmul.f32 %v1985_v44, %v4467_v47  ;;  %v1992_v53 = vmul.f32 %v1986_v45, %v4469_v48 }
 0x2dc   :  { %v3816_v54 = vpack.c.bf16 %v1988_v49, %v1987_v46  ;;  %v3817_v55 = vpack.c.bf16 %v1990_v51, %v1989_v50  ;;  %v4509_v2 = vpack.c.bf16 %v1987_v46, %v1987_v46  ;;  %v4514_v3 = vpack.c.bf16 %v1989_v50, %v1989_v50 }
 0x2dd   :  { %v3818_v4 = vpack.c.bf16 %v1992_v53, %v1991_v52  ;;  %v4519_v5 = vpack.c.bf16 %v1991_v52, %v1991_v52  ;;  %v4048_v8 = vpack.c.bf16 %v1988_v49, %v1988_v49  ;;  %v4049_v9 = vpack.c.bf16 %v1990_v51, %v1990_v51  ;;  %v3760_v49 = vld [vmem:[%s4794_s5 + $0x4] sm:$0xf] }
 0x2de   :  { %2019 = vst [vmem:[#allocation2 + $0x4] sm:$0xff] %v3816_v54  ;;  %2020 = vst [vmem:[#allocation2 + $0xc] sm:$0xff] %v3817_v55  ;;  %v4530_v10 = vpack.c.bf16 %v1992_v53, %v1992_v53  ;;  %v2217_v20 = vsel %vm2071_vm10, %v4509_v2, 0  ;;  %v2223_v34 = vsel %vm2071_vm10, %v4514_v3, 0 }
 0x2df   :  { %2021 = vst [vmem:[#allocation2 + $0x14] sm:$0xff] %v3818_v4  ;;  %v2229_v38 = vsel %vm2071_vm10, %v4519_v5, 0 }
 0x2e5   :  { %v2025_v56 = vld [vmem:[#allocation2] sm:$0xff]  ;;  %v2026_v60 = vld [vmem:[#allocation2 + $0x8] sm:$0xff] }
 0x2e6   :  { %v4033_v57 = vld [vmem:[#allocation2 + $0x18] ss:$0 sps:$4 sm:$0xff]   ;;  %v3741_v58 = vcombine.low %v2025_v56, %v2025_v56  ;;  %v3742_v59 = vcombine.high %v2025_v56, %v2025_v56  ;;  %v3744_v61 = vcombine.high %v2026_v60, %v2026_v60  ;;  %v3743_v62 = vcombine.low %v2026_v60, %v2026_v60  ;;  %v2027_v63 = vld [vmem:[#allocation2 + $0x10] sm:$0xff] }
 0x2e7   :  { %2059 = vrot.lane.b32.xlu0 %v4033_v57, %s4053_s9  ;;  %v3746_v0 = vcombine.high %v2027_v63, %v2027_v63  ;;  %v3745_v1 = vcombine.low %v2027_v63, %v2027_v63 }
 0x2e8   :  { %2047 = vrot.lane.b32.xlu1 %v3741_v58, %s4053_s9 }
 0x2eb   :  { %2361 = vrot.lane.b32.xlu0 %v3742_v59, %s4054_s10 }
 0x2ec   :  { %2049 = vrot.lane.b32.xlu1 %v3742_v59, %s4053_s9 }
 0x2ef   :  { %2365 = vrot.lane.b32.xlu0 %v3744_v61, %s4054_s10 }
 0x2f0   :  { %2051 = vrot.lane.b32.xlu1 %v3743_v62, %s4053_s9 }
 0x2f3   :  { %2369 = vrot.lane.b32.xlu0 %v3746_v0, %s4054_s10 }
 0x2f4   :  { %2053 = vrot.lane.b32.xlu1 %v3744_v61, %s4053_s9 }
 0x2f7   :  { %2531 = vrot.lane.b32.xlu0 %v3741_v58, %s4055_s15 }
 0x2f8   :  { %2055 = vrot.lane.b32.xlu1 %v3745_v1, %s4053_s9 }
 0x2fb   :  { %2535 = vrot.lane.b32.xlu0 %v3743_v62, %s4055_s15 }
 0x2fc   :  { %2057 = vrot.lane.b32.xlu1 %v3746_v0, %s4053_s9 }
 0x2ff   :  { %2539 = vrot.lane.b32.xlu0 %v3745_v1, %s4055_s15 }
 0x300   :  { %2359 = vrot.lane.b32.xlu1 %v3741_v58, %s4054_s10 }
 0x303   :  { %2543 = vrot.lane.b32.xlu0 %v4033_v57, %s4055_s15 }
 0x304   :  { %2363 = vrot.lane.b32.xlu1 %v3743_v62, %s4054_s10 }
 0x307   :  { %2705 = vrot.lane.b32.xlu0 %v3742_v59, %s4056_s16 }
 0x308   :  { %2367 = vrot.lane.b32.xlu1 %v3745_v1, %s4054_s10 }
 0x30b   :  { %2709 = vrot.lane.b32.xlu0 %v3744_v61, %s4056_s16 }
 0x30c   :  { %2371 = vrot.lane.b32.xlu1 %v4033_v57, %s4054_s10 }
 0x30f   :  { %2713 = vrot.lane.b32.xlu0 %v3746_v0, %s4056_s16 }
 0x310   :  { %2533 = vrot.lane.b32.xlu1 %v3742_v59, %s4055_s15 }
 0x313   :  { %2897 = vrot.lane.b32.xlu0 %v4509_v2, %s4057_s23 }
 0x314   :  { %2537 = vrot.lane.b32.xlu1 %v3744_v61, %s4055_s15 }
 0x317   :  { %2901 = vrot.lane.b32.xlu0 %v4514_v3, %s4057_s23 }
 0x318   :  { %2541 = vrot.lane.b32.xlu1 %v3746_v0, %s4055_s15 }
 0x31b   :  { %2905 = vrot.lane.b32.xlu0 %v4519_v5, %s4057_s23 }
 0x31c   :  { %2703 = vrot.lane.b32.xlu1 %v3741_v58, %s4056_s16 }
 0x31f   :  { %2909 = vrot.lane.b32.xlu0 %v4040_v6, %s4057_s23 }
 0x320   :  { %2707 = vrot.lane.b32.xlu1 %v3743_v62, %s4056_s16 }
 0x323   :  { %3071 = vrot.lane.b32.xlu0 %v4048_v8, %s4058_s24 }
 0x324   :  { %2711 = vrot.lane.b32.xlu1 %v3745_v1, %s4056_s16  ;;  %v3767_v1 = vld [vmem:[%s4794_s5 + $0x8] sm:$0xf] }
 0x327   :  { %3075 = vrot.lane.b32.xlu0 %v4049_v9, %s4058_s24 }
 0x328   :  { %2715 = vrot.lane.b32.xlu1 %v4033_v57, %s4056_s16 }
 0x32b   :  { %3079 = vrot.lane.b32.xlu0 %v4530_v10, %s4058_s24 }
 0x32c   :  { %2899 = vrot.lane.b32.xlu1 %v4048_v8, %s4057_s23 }
 0x32f   :  { %3241 = vrot.lane.b32.xlu0 %v4509_v2, %s4059_s29 }
 0x330   :  { %2903 = vrot.lane.b32.xlu1 %v4049_v9, %s4057_s23 }
 0x333   :  { %3245 = vrot.lane.b32.xlu0 %v4514_v3, %s4059_s29 }
 0x334   :  { %2907 = vrot.lane.b32.xlu1 %v4530_v10, %s4057_s23 }
 0x337   :  { %3249 = vrot.lane.b32.xlu0 %v4519_v5, %s4059_s29 }
 0x338   :  { %3069 = vrot.lane.b32.xlu1 %v4509_v2, %s4058_s24 }
 0x33b   :  { %3253 = vrot.lane.b32.xlu0 %v4040_v6, %s4059_s29 }
 0x33c   :  { %3073 = vrot.lane.b32.xlu1 %v4514_v3, %s4058_s24 }
 0x33f   :  { %3415 = vrot.lane.b32.xlu0 %v4048_v8, %s4060_s30 }
 0x340   :  { %3077 = vrot.lane.b32.xlu1 %v4519_v5, %s4058_s24 }
 0x343   :  { %3419 = vrot.lane.b32.xlu0 %v4049_v9, %s4060_s30 }
 0x344   :  { %3081 = vrot.lane.b32.xlu1 %v4040_v6, %s4058_s24 }
 0x347   :  { %3423 = vrot.lane.b32.xlu0 %v4530_v10, %s4060_s30 }
 0x348   :  { %3243 = vrot.lane.b32.xlu1 %v4048_v8, %s4059_s29 }
 0x34c   :  { %3247 = vrot.lane.b32.xlu1 %v4049_v9, %s4059_s29 }
 0x350   :  { %3251 = vrot.lane.b32.xlu1 %v4530_v10, %s4059_s29 }
 0x354   :  { %3413 = vrot.lane.b32.xlu1 %v4509_v2, %s4060_s30 }
 0x358   :  { %3417 = vrot.lane.b32.xlu1 %v4514_v3, %s4060_s30 }
 0x359   :  { %v2060_v27 = vpop.permute.xlu0 %2059 }
 0x35a   :  { %v2048_v11 = vpop.permute.xlu1 %2047 }
 0x35c   :  { %3421 = vrot.lane.b32.xlu1 %v4519_v5, %s4060_s30 }
 0x35d   :  { %v2362_v37 = vpop.permute.xlu0 %2361 }
 0x35e   :  { %v2050_v12 = vpop.permute.xlu1 %2049 }
 0x35f   :  { %v2061_v13 = vsel %vm87_vm0, %v2048_v11, %v2050_v12 }
 0x360   :  { %3425 = vrot.lane.b32.xlu1 %v4040_v6, %s4060_s30  ;;  %v2073_v16 = vsel %vm2071_vm10, %v2061_v13, 0 }
 0x361   :  { %v2366_v41 = vpop.permute.xlu0 %2365 }
 0x362   :  { %v2052_v14 = vpop.permute.xlu1 %2051 }
 0x363   :  { %v2062_v15 = vsel %vm87_vm0, %v2050_v12, %v2052_v14 }
 0x364   :  { %3748 = vmatprep.subr.msk.bf16.mxu1 %vm2071_vm10, %v2062_v15 }
 0x365   :  { %2091 = vmatpush1.bf16.msra.mxu1 %v2073_v16  ;;  %v2370_v45 = vpop.permute.xlu0 %2369 }
 0x366   :  { %v2054_v21 = vpop.permute.xlu1 %2053 }
 0x367   :  { %v2063_v23 = vsel %vm87_vm0, %v2052_v14, %v2054_v21 }
 0x368   :  { %3749 = vmatmul.mubr.msk.bf16.vlgmr.msra.gmra.mrb[0].mxu1 %vm2067_vm11, %v2024_v17  ;;  %v2079_v26 = vsel %vm2071_vm10, %v2063_v23, 0 }
 0x369   :  { %2163 = vmatprep.mubr.bf16.mxu1 %v4052_v7  ;;  %v2532_v53 = vpop.permute.xlu0 %2531 }
 0x36a   :  { %v2056_v24 = vpop.permute.xlu1 %2055 }
 0x36b   :  { %v2064_v25 = vsel %vm87_vm0, %v2054_v21, %v2056_v24 }
 0x36c   :  { %3750 = vmatprep.subr.msk.bf16.mxu1 %vm2071_vm10, %v2064_v25 }
 0x36d   :  { %2132 = vmatpush1.bf16.msra.mxu1 %v2079_v26  ;;  %v2536_v4 = vpop.permute.xlu0 %2535 }
 0x36e   :  { %v2058_v28 = vpop.permute.xlu1 %2057 }
 0x36f   :  { %v2065_v29 = vsel %vm87_vm0, %v2056_v24, %v2058_v28  ;;  %v2066_v30 = vsel %vm87_vm0, %v2058_v28, %v2060_v27  ;;  %v3774_v24 = vld [vmem:[%s4794_s5 + $0xc] sm:$0xf] }
 0x370   :  { %v2085_v32 = vsel %vm2071_vm10, %v2065_v29, 0  ;;  %3751 = vmatmul.mubr.msk.bf16.vlgmr.msra.gmra.mrb[4].mxu1 %vm2067_vm11, %v2024_v17  ;;  %3752 = vmatprep.subr.msk.bf16.mxu1 %vm2071_vm10, %v2066_v30 }
 0x371   :  { %2173 = vmatpush1.bf16.msra.mxu1 %v2085_v32  ;;  %2204 = vmatprep.mubr.bf16.mxu1 %v4052_v7  ;;  %v2540_v60 = vpop.permute.xlu0 %2539 }
 0x372   :  { %3754 = vmatprep.subr.msk.bf16.mxu1 %vm2071_vm10, %v4048_v8  ;;  %v2360_v22 = vpop.permute.xlu1 %2359 }
 0x373   :  { %v2373_v40 = vsel %vm464_vm3, %v2360_v22, %v2362_v37 }
 0x374   :  { %v2383_v43 = vsel %vm2071_vm10, %v2373_v40, 0 }
 0x375   :  { %v2544_v2 = vpop.permute.xlu0 %2543 }
 0x376   :  { %v2364_v36 = vpop.permute.xlu1 %2363 }
 0x377   :  { %v2374_v39 = vsel %vm464_vm3, %v2362_v37, %v2364_v36  ;;  %v2375_v46 = vsel %vm464_vm3, %v2364_v36, %v2366_v41 }
 0x378   :  { %3753 = vmatmul.mubr.msk.bf16.vlgmr.msra.gmra.mrb[8].mxu1 %vm2067_vm11, %v2024_v17  ;;  %v2389_v51 = vsel %vm2071_vm10, %v2375_v46, 0 }
 0x379   :  { %2235 = vmatpush1.bf16.msra.mxu1 %v2217_v20  ;;  %2266 = vmatprep.mubr.bf16.mxu1 %v4052_v7 }
 0x37a   :  { %3756 = vmatprep.subr.msk.bf16.mxu1 %vm2071_vm10, %v4049_v9  ;;  %v2368_v42 = vpop.permute.xlu1 %2367 }
 0x37b   :  { %v2376_v44 = vsel %vm464_vm3, %v2366_v41, %v2368_v42  ;;  %v2377_v54 = vsel %vm464_vm3, %v2368_v42, %v2370_v45  ;;  %v3781_v41 = vld [vmem:[%s4794_s5 + $0x14] sm:$0xf] }
 0x37c   :  { %v2395_v56 = vsel %vm2071_vm10, %v2377_v54, 0 }
 0x37e   :  { %v2372_v50 = vpop.permute.xlu1 %2371 }
 0x37f   :  { %v2378_v52 = vsel %vm464_vm3, %v2370_v45, %v2372_v50 }
 0x380   :  { %3755 = vmatmul.mubr.msk.bf16.vlgmr.msra.gmra.mrb[0].mxu1 %vm2067_vm11, %v3740_v35 }
 0x381   :  { %2276 = vmatpush1.bf16.msra.mxu1 %v2223_v34  ;;  %2307 = vmatprep.mubr.bf16.mxu1 %v4052_v7 }
 0x382   :  { %3758 = vmatprep.subr.msk.bf16.mxu1 %vm2071_vm10, %v4530_v10  ;;  %v2534_v55 = vpop.permute.xlu1 %2533  ;;  %v2706_v10 = vpop.permute.xlu0 %2705 }
 0x383   :  { %v2546_v57 = vsel %vm674_vm4, %v2534_v55, %v2536_v4  ;;  %v2545_v59 = vsel %vm674_vm4, %v2532_v53, %v2534_v55 }
 0x384   :  { %v2555_v61 = vsel %vm2071_vm10, %v2545_v59, 0  ;;  %v3795_v59 = vld [vmem:[%s4794_s5 + $0x18] sm:$0xf] }
 0x386   :  { %v2538_v58 = vpop.permute.xlu1 %2537  ;;  %v2710_v14 = vpop.permute.xlu0 %2709 }
 0x387   :  { %v2548_v62 = vsel %vm674_vm4, %v2538_v58, %v2540_v60  ;;  %v2547_v0 = vsel %vm674_vm4, %v2536_v4, %v2538_v58 }
 0x388   :  { %3757 = vmatmul.mubr.msk.bf16.vlgmr.msra.gmra.mrb[4].mxu1 %vm2067_vm11, %v3740_v35  ;;  %v2561_v3 = vsel %vm2071_vm10, %v2547_v0, 0 }
 0x389   :  { %2317 = vmatpush1.bf16.msra.mxu1 %v2229_v38  ;;  %2348 = vmatprep.mubr.bf16.mxu1 %v4052_v7 }
 0x38a   :  { %3761 = vmatprep.subr.msk.bf16.mxu1 %vm2071_vm10, %v2374_v39  ;;  %v2542_v63 = vpop.permute.xlu1 %2541  ;;  %v2714_v21 = vpop.permute.xlu0 %2713 }
 0x38b   :  { %v2550_v6 = vsel %vm674_vm4, %v2542_v63, %v2544_v2  ;;  %v2549_v8 = vsel %vm674_vm4, %v2540_v60, %v2542_v63 }
 0x38c   :  { %v2567_v11 = vsel %vm2071_vm10, %v2549_v8, 0 }
 0x38e   :  { %v2704_v5 = vpop.permute.xlu1 %2703  ;;  %v2898_v28 = vpop.permute.xlu0 %2897 }
 0x38f   :  { %v2717_v13 = vsel %vm884_vm5, %v2704_v5, %v2706_v10 }
 0x390   :  { %3759 = vmatmul.mubr.msk.bf16.vlgmr.msra.gmra.mrb[8].mxu1 %vm2067_vm11, %v3740_v35  ;;  %v2727_v16 = vsel %vm2071_vm10, %v2717_v13, 0 }
 0x391   :  { %2401 = vmatpush1.bf16.msra.mxu1 %v2383_v43  ;;  %2432 = vmatprep.mubr.bf16.mxu1 %v4052_v7 }
 0x392   :  { %3763 = vmatprep.subr.msk.bf16.mxu1 %vm2071_vm10, %v2376_v44  ;;  %v2708_v9 = vpop.permute.xlu1 %2707  ;;  %v2902_v32 = vpop.permute.xlu0 %2901 }
 0x393   :  { %v2718_v12 = vsel %vm884_vm5, %v2706_v10, %v2708_v9  ;;  %v2719_v23 = vsel %vm884_vm5, %v2708_v9, %v2710_v14 }
 0x394   :  { %v2733_v26 = vsel %vm2071_vm10, %v2719_v23, 0 }
 0x396   :  { %v2712_v15 = vpop.permute.xlu1 %2711  ;;  %v2906_v36 = vpop.permute.xlu0 %2905 }
 0x397   :  { %v2720_v17 = vsel %vm884_vm5, %v2710_v14, %v2712_v15  ;;  %v2721_v29 = vsel %vm884_vm5, %v2712_v15, %v2714_v21  ;;  %v3802_v14 = vld [vmem:[%s4794_s5 + $0x1c] sm:$0xf] }
 0x398   :  { %3762 = vmatmul.mubr.msk.bf16.vlgmr.msra.gmra.mrb[0].mxu1 %vm2067_vm11, %v3760_v49  ;;  %v2739_v20 = vsel %vm2071_vm10, %v2721_v29, 0 }
 0x399   :  { %2442 = vmatpush1.bf16.msra.mxu1 %v2389_v51  ;;  %2473 = vmatprep.mubr.bf16.mxu1 %v4052_v7 }
 0x39a   :  { %3765 = vmatprep.subr.msk.bf16.mxu1 %vm2071_vm10, %v2378_v52  ;;  %v2716_v25 = vpop.permute.xlu1 %2715  ;;  %v2910_v42 = vpop.permute.xlu0 %2909 }
 0x39b   :  { %v2722_v27 = vsel %vm884_vm5, %v2714_v21, %v2716_v25 }
 0x39e   :  { %v2900_v30 = vpop.permute.xlu1 %2899  ;;  %v3072_v50 = vpop.permute.xlu0 %3071 }
 0x39f   :  { %v2912_v35 = vsel %vm1094_vm6, %v2900_v30, %v2902_v32  ;;  %v2911_v34 = vsel %vm1094_vm6, %v2898_v28, %v2900_v30 }
 0x3a0   :  { %3764 = vmatmul.mubr.msk.bf16.vlgmr.msra.gmra.mrb[4].mxu1 %vm2067_vm11, %v3760_v49  ;;  %v2921_v37 = vsel %vm2071_vm10, %v2911_v34, 0 }
 0x3a1   :  { %2483 = vmatpush1.bf16.msra.mxu1 %v2395_v56  ;;  %2514 = vmatprep.mubr.bf16.mxu1 %v4052_v7 }
 0x3a2   :  { %3768 = vmatprep.subr.msk.bf16.mxu1 %vm2071_vm10, %v2546_v57  ;;  %v2904_v22 = vpop.permute.xlu1 %2903  ;;  %v3076_v54 = vpop.permute.xlu0 %3075 }
 0x3a3   :  { %v2914_v38 = vsel %vm1094_vm6, %v2904_v22, %v2906_v36  ;;  %v2913_v40 = vsel %vm1094_vm6, %v2902_v32, %v2904_v22  ;;  %v3809_v22 = vld [vmem:[%s4794_s5 + $0x20] sm:$0xf] }
 0x3a4   :  { %v2927_v43 = vsel %vm2071_vm10, %v2913_v40, 0 }
 0x3a6   :  { %v2908_v39 = vpop.permute.xlu1 %2907  ;;  %v3080_v57 = vpop.permute.xlu0 %3079 }
 0x3a7   :  { %v2916_v45 = vsel %vm1094_vm6, %v2908_v39, %v2910_v42  ;;  %v2915_v46 = vsel %vm1094_vm6, %v2906_v36, %v2908_v39 }
 0x3a8   :  { %3766 = vmatmul.mubr.msk.bf16.vlgmr.msra.gmra.mrb[8].mxu1 %vm2067_vm11, %v3760_v49  ;;  %v2933_v51 = vsel %vm2071_vm10, %v2915_v46, 0 }
 0x3a9   :  { %2573 = vmatpush1.bf16.msra.mxu1 %v2555_v61  ;;  %2604 = vmatprep.mubr.bf16.mxu1 %v4052_v7 }
 0x3aa   :  { %3770 = vmatprep.subr.msk.bf16.mxu1 %vm2071_vm10, %v2548_v62  ;;  %v3070_v44 = vpop.permute.xlu1 %3069  ;;  %v3242_v63 = vpop.permute.xlu0 %3241 }
 0x3ab   :  { %v3083_v53 = vsel %vm1304_vm7, %v3070_v44, %v3072_v50 }
 0x3ac   :  { %v3093_v4 = vsel %vm2071_vm10, %v3083_v53, 0 }
 0x3ae   :  { %v3074_v49 = vpop.permute.xlu1 %3073  ;;  %v3246_v2 = vpop.permute.xlu0 %3245 }
 0x3af   :  { %v3084_v52 = vsel %vm1304_vm7, %v3072_v50, %v3074_v49  ;;  %v3085_v58 = vsel %vm1304_vm7, %v3074_v49, %v3076_v54 }
 0x3b0   :  { %3769 = vmatmul.mubr.msk.bf16.vlgmr.msra.gmra.mrb[0].mxu1 %vm2067_vm11, %v3767_v1  ;;  %v3099_v61 = vsel %vm2071_vm10, %v3085_v58, 0 }
 0x3b1   :  { %2614 = vmatpush1.bf16.msra.mxu1 %v2561_v3  ;;  %2645 = vmatprep.mubr.bf16.mxu1 %v4052_v7 }
 0x3b2   :  { %3772 = vmatprep.subr.msk.bf16.mxu1 %vm2071_vm10, %v2550_v6  ;;  %v3078_v55 = vpop.permute.xlu1 %3077  ;;  %v3250_v9 = vpop.permute.xlu0 %3249 }
 0x3b3   :  { %v3086_v56 = vsel %vm1304_vm7, %v3076_v54, %v3078_v55  ;;  %v3087_v0 = vsel %vm1304_vm7, %v3078_v55, %v3080_v57 }
 0x3b4   :  { %v3105_v3 = vsel %vm2071_vm10, %v3087_v0, 0 }
 0x3b6   :  { %v3082_v60 = vpop.permute.xlu1 %3081  ;;  %v3254_v15 = vpop.permute.xlu0 %3253 }
 0x3b7   :  { %v3088_v62 = vsel %vm1304_vm7, %v3080_v57, %v3082_v60 }
 0x3b8   :  { %3771 = vmatmul.mubr.msk.bf16.vlgmr.msra.gmra.mrb[4].mxu1 %vm2067_vm11, %v3767_v1 }
 0x3b9   :  { %2655 = vmatpush1.bf16.msra.mxu1 %v2567_v11  ;;  %2686 = vmatprep.mubr.bf16.mxu1 %v4052_v7 }
 0x3ba   :  { %3775 = vmatprep.subr.msk.bf16.mxu1 %vm2071_vm10, %v2718_v12  ;;  %v3416_v25 = vpop.permute.xlu0 %3415 }
 0x3be   :  { %v3420_v30 = vpop.permute.xlu0 %3419 }
 0x3c0   :  { %3773 = vmatmul.mubr.msk.bf16.vlgmr.msra.gmra.mrb[8].mxu1 %vm2067_vm11, %v3767_v1  ;;  %v3244_v1 = vpop.permute.xlu1 %3243 }
 0x3c1   :  { %2745 = vmatpush1.bf16.msra.mxu1 %v2727_v16  ;;  %2776 = vmatprep.mubr.bf16.mxu1 %v4052_v7  ;;  %v3256_v5 = vsel %vm1514_vm8, %v3244_v1, %v3246_v2  ;;  %v3255_v8 = vsel %vm1514_vm8, %v3242_v63, %v3244_v1 }
 0x3c2   :  { %3777 = vmatprep.subr.msk.bf16.mxu1 %vm2071_vm10, %v2720_v17  ;;  %v3265_v10 = vsel %vm2071_vm10, %v3255_v8, 0  ;;  %v3424_v36 = vpop.permute.xlu0 %3423 }
 0x3c4   :  { %v3248_v6 = vpop.permute.xlu1 %3247 }
 0x3c5   :  { %v3258_v11 = vsel %vm1514_vm8, %v3248_v6, %v3250_v9  ;;  %v3257_v13 = vsel %vm1514_vm8, %v3246_v2, %v3248_v6 }
 0x3c6   :  { %v3271_v16 = vsel %vm2071_vm10, %v3257_v13, 0  ;;  %v3640_v13 = vld [vmem:[%s4795_s7] sm:$0xff] }
 0x3c8   :  { %3776 = vmatmul.mubr.msk.bf16.vlgmr.msra.gmra.mrb[0].mxu1 %vm2067_vm11, %v3774_v24  ;;  %v3252_v12 = vpop.permute.xlu1 %3251 }
 0x3c9   :  { %2786 = vmatpush1.bf16.msra.mxu1 %v2733_v26  ;;  %2817 = vmatprep.mubr.bf16.mxu1 %v4052_v7  ;;  %v3260_v21 = vsel %vm1514_vm8, %v3252_v12, %v3254_v15  ;;  %v3259_v23 = vsel %vm1514_vm8, %v3250_v9, %v3252_v12 }
 0x3ca   :  { %3779 = vmatprep.subr.msk.bf16.mxu1 %vm2071_vm10, %v2722_v27  ;;  %v3277_v26 = vsel %vm2071_vm10, %v3259_v23, 0 }
 0x3cc   :  { %v3414_v17 = vpop.permute.xlu1 %3413 }
 0x3cd   :  { %v3427_v28 = vsel %vm1724_vm9, %v3414_v17, %v3416_v25 }
 0x3ce   :  { %v3437_v32 = vsel %vm2071_vm10, %v3427_v28, 0 }
 0x3d0   :  { %3778 = vmatmul.mubr.msk.bf16.vlgmr.msra.gmra.mrb[4].mxu1 %vm2067_vm11, %v3774_v24 }
 0x3d1   :  { %2827 = vmatpush1.bf16.msra.mxu1 %v2739_v20  ;;  %2858 = vmatprep.mubr.bf16.mxu1 %v4052_v7 }
 0x3d2   :  { %3789 = vmatprep.subr.msk.bf16.mxu1 %vm2071_vm10, %v2912_v35 }
 0x3d8   :  { %3780 = vmatmul.mubr.msk.bf16.vlgmr.msra.gmra.mrb[8].mxu1 %vm2067_vm11, %v3774_v24  ;;  %v3418_v24 = vpop.permute.xlu1 %3417 }
 0x3d9   :  { %2939 = vmatpush1.bf16.msra.mxu1 %v2921_v37  ;;  %2970 = vmatprep.mubr.bf16.mxu1 %v4052_v7  ;;  %v3428_v27 = vsel %vm1724_vm9, %v3416_v25, %v3418_v24  ;;  %v3429_v35 = vsel %vm1724_vm9, %v3418_v24, %v3420_v30 }
 0x3da   :  { %3791 = vmatprep.subr.msk.bf16.mxu1 %vm2071_vm10, %v2914_v38  ;;  %v3443_v37 = vsel %vm2071_vm10, %v3429_v35, 0 }
 0x3dc   :  { %v3422_v29 = vpop.permute.xlu1 %3421 }
 0x3dd   :  { %v3430_v20 = vsel %vm1724_vm9, %v3420_v30, %v3422_v29  ;;  %v3431_v39 = vsel %vm1724_vm9, %v3422_v29, %v3424_v36 }
 0x3de   :  { %v3449_v40 = vsel %vm2071_vm10, %v3431_v39, 0 }
 0x3e0   :  { %3790 = vmatmul.mubr.msk.bf16.vlgmr.msra.gmra.mrb[0].mxu1 %vm2067_vm11, %v3781_v41  ;;  %v3426_v34 = vpop.permute.xlu1 %3425 }
 0x3e1   :  { %2980 = vmatpush1.bf16.msra.mxu1 %v2927_v43  ;;  %3011 = vmatprep.mubr.bf16.mxu1 %v4052_v7  ;;  %v3432_v38 = vsel %vm1724_vm9, %v3424_v36, %v3426_v34 }
 0x3e2   :  { %3793 = vmatprep.subr.msk.bf16.mxu1 %vm2071_vm10, %v2916_v45 }
 0x3e8   :  { %3792 = vmatmul.mubr.msk.bf16.vlgmr.msra.gmra.mrb[4].mxu1 %vm2067_vm11, %v3781_v41 }
 0x3e9   :  { %3021 = vmatpush1.bf16.msra.mxu1 %v2933_v51  ;;  %3052 = vmatprep.mubr.bf16.mxu1 %v4052_v7 }
 0x3ea   :  { %3796 = vmatprep.subr.msk.bf16.mxu1 %vm2071_vm10, %v3084_v52 }
 0x3f0   :  { %3794 = vmatmul.mubr.msk.bf16.vlgmr.msra.gmra.mrb[8].mxu1 %vm2067_vm11, %v3781_v41 }
 0x3f1   :  { %3111 = vmatpush1.bf16.msra.mxu1 %v3093_v4  ;;  %3142 = vmatprep.mubr.bf16.mxu1 %v4052_v7 }
 0x3f2   :  { %3798 = vmatprep.subr.msk.bf16.mxu1 %vm2071_vm10, %v3086_v56 }
 0x3f8   :  { %3797 = vmatmul.mubr.msk.bf16.vlgmr.msra.gmra.mrb[0].mxu1 %vm2067_vm11, %v3795_v59 }
 0x3f9   :  { %3152 = vmatpush1.bf16.msra.mxu1 %v3099_v61  ;;  %3183 = vmatprep.mubr.bf16.mxu1 %v4052_v7 }
 0x3fa   :  { %3800 = vmatprep.subr.msk.bf16.mxu1 %vm2071_vm10, %v3088_v62 }
 0x400   :  { %3799 = vmatmul.mubr.msk.bf16.vlgmr.msra.gmra.mrb[4].mxu1 %vm2067_vm11, %v3795_v59 }
 0x401   :  { %3193 = vmatpush1.bf16.msra.mxu1 %v3105_v3  ;;  %3224 = vmatprep.mubr.bf16.mxu1 %v4052_v7 }
 0x402   :  { %3803 = vmatprep.subr.msk.bf16.mxu1 %vm2071_vm10, %v3256_v5 }
 0x408   :  { %3801 = vmatmul.mubr.msk.bf16.vlgmr.msra.gmra.mrb[8].mxu1 %vm2067_vm11, %v3795_v59 }
 0x409   :  { %3283 = vmatpush1.bf16.msra.mxu1 %v3265_v10  ;;  %3314 = vmatprep.mubr.bf16.mxu1 %v4052_v7 }
 0x40a   :  { %3805 = vmatprep.subr.msk.bf16.mxu1 %vm2071_vm10, %v3258_v11 }
 0x410   :  { %3804 = vmatmul.mubr.msk.bf16.vlgmr.msra.gmra.mrb[0].mxu1 %vm2067_vm11, %v3802_v14 }
 0x411   :  { %3324 = vmatpush1.bf16.msra.mxu1 %v3271_v16  ;;  %3355 = vmatprep.mubr.bf16.mxu1 %v4052_v7 }
 0x412   :  { %3807 = vmatprep.subr.msk.bf16.mxu1 %vm2071_vm10, %v3260_v21 }
 0x418   :  { %3806 = vmatmul.mubr.msk.bf16.vlgmr.msra.gmra.mrb[4].mxu1 %vm2067_vm11, %v3802_v14 }
 0x419   :  { %3365 = vmatpush1.bf16.msra.mxu1 %v3277_v26  ;;  %3396 = vmatprep.mubr.bf16.mxu1 %v4052_v7 }
 0x41a   :  { %3810 = vmatprep.subr.msk.bf16.mxu1 %vm2071_vm10, %v3428_v27 }
 0x420   :  { %3808 = vmatmul.mubr.msk.bf16.vlgmr.msra.gmra.mrb[8].mxu1 %vm2067_vm11, %v3802_v14  ;;  %v3628_v14 = vld [vmem:[%s4796_s6] sm:$0xff] }
 0x421   :  { %3455 = vmatpush1.bf16.msra.mxu1 %v3437_v32  ;;  %3486 = vmatprep.mubr.bf16.mxu1 %v4052_v7 }
 0x422   :  { %3812 = vmatprep.subr.msk.bf16.mxu1 %vm2071_vm10, %v3430_v20 }
 0x428   :  { %3811 = vmatmul.mubr.msk.bf16.vlgmr.msra.gmra.mrb[0].mxu1 %vm2067_vm11, %v3809_v22 }
 0x429   :  { %3496 = vmatpush1.bf16.msra.mxu1 %v3443_v37  ;;  %3527 = vmatprep.mubr.bf16.mxu1 %v4052_v7 }
 0x42a   :  { %3814 = vmatprep.subr.msk.bf16.mxu1 %vm2071_vm10, %v3432_v38 }
 0x430   :  { %3813 = vmatmul.mubr.msk.bf16.vlgmr.msra.gmra.mrb[4].mxu1 %vm2067_vm11, %v3809_v22 }
 0x431   :  { %3537 = vmatpush1.bf16.msra.mxu1 %v3449_v40  ;;  %3568 = vmatprep.mubr.bf16.mxu1 %v4052_v7 }
 0x438   :  { %3815 = vmatmul.mubr.msk.bf16.vlgmr.msra.gmra.mrb[8].mxu1 %vm2067_vm11, %v3809_v22 }
 0x4fb   :  { %v3488_v41 = vpop.f32.mrb[0].mxu1 }
 0x4fc   :  { %v3583_v42 = vmul.f32 %v3488_v41, %v4445_v18  ;;  %v3490_v43 = vpop.f32.mrb[1].mxu1 }
 0x4fd   :  { %v3584_v44 = vmul.f32 %v3490_v43, %v4447_v19  ;;  %v3492_v45 = vpop.f32.mrb[2].mxu1 }
 0x4fe   :  { %v3589_v46 = vmul.f32 %v3583_v42, %v3583_v42  ;;  %v3493_v49 = vpop.f32.mrb[3].mxu1 }
 0x4ff   :  { %v3590_v50 = vmul.f32 %v3584_v44, %v3584_v44  ;;  %v3595_v51 = vadd.f32 %v3584_v44, %v3583_v42 }
 0x501   :  { %v3602_v52 = vadd.f32 %v3590_v50, %v3589_v46 }
 0x503   :  { %v3529_v53 = vpop.f32.mrb[4].mxu1 }
 0x504   :  { %v3585_v54 = vmul.f32 %v3529_v53, %v4459_v31  ;;  %v3531_v55 = vpop.f32.mrb[5].mxu1 }
 0x505   :  { %v3586_v7 = vmul.f32 %v3531_v55, %v4461_v33  ;;  %v3533_v4 = vpop.f32.mrb[6].mxu1 }
 0x506   :  { %v3591_v56 = vmul.f32 %v3585_v54, %v3585_v54  ;;  %v3596_v57 = vadd.f32 %v3595_v51, %v3585_v54  ;;  %v3534_v58 = vpop.f32.mrb[7].mxu1 }
 0x507   :  { %v3592_v59 = vmul.f32 %v3586_v7, %v3586_v7 }
 0x508   :  { %v3603_v60 = vadd.f32 %v3602_v52, %v3591_v56  ;;  %v3597_v61 = vadd.f32 %v3596_v57, %v3586_v7 }
 0x50a   :  { %v3604_v62 = vadd.f32 %v3603_v60, %v3592_v59 }
 0x50b   :  { %v3570_v63 = vpop.f32.mrb[8].mxu1 }
 0x50c   :  { %v3587_v0 = vmul.f32 %v3570_v63, %v4467_v47  ;;  %v3572_v1 = vpop.f32.mrb[9].mxu1 }
 0x50d   :  { %v3588_v2 = vmul.f32 %v3572_v1, %v4469_v48  ;;  %v3574_v3 = vpop.f32.mrb[10].mxu1 }
 0x50e   :  { %v3593_v5 = vmul.f32 %v3587_v0, %v3587_v0  ;;  %v3598_v6 = vadd.f32 %v3597_v61, %v3587_v0  ;;  %v3575_v8 = vpop.f32.mrb[11].mxu1 }
 0x50f   :  { %v3594_v9 = vmul.f32 %v3588_v2, %v3588_v2 }
 0x510   :  { %v3605_v10 = vadd.f32 %v3604_v62, %v3593_v5  ;;  %v3599_v11 = vadd.f32 %v3598_v6, %v3588_v2 }
 0x512   :  { %3600 = vadd.xlane.f32.xlu0 %v3599_v11  ;;  %v3606_v12 = vadd.f32 %v3605_v10, %v3594_v9 }
 0x514   :  { %3607 = vadd.xlane.f32.xlu1 %v3606_v12 }
 0x525   :  { %3643 = vperm.xlu1 %4022, %v3640_v13  }
 0x528   :  { %3631 = vperm.xlu0 %4021, %v3628_v14  }
 0x59f   :  { %v3601_v15 = vpop.xlane.xlu0 %3600 }
 0x5a0   :  { %v3609_v16 = vmul.f32 0.001953125, %v3601_v15 }
 0x5a1   :  { %v3608_v17 = vpop.xlane.xlu1 %3607 }
 0x5a2   :  { %v3611_v21 = vmul.f32 %v3609_v16, %v3609_v16  ;;  %v3610_v23 = vmul.f32 0.001953125, %v3608_v17  ;;  %v3614_v27 = vsub.f32 %v3488_v41, %v3609_v16  ;;  %v3615_v28 = vsub.f32 %v3490_v43, %v3609_v16 }
 0x5a3   :  { %v3616_v29 = vsub.f32 %v3529_v53, %v3609_v16  ;;  %v3617_v30 = vsub.f32 %v3531_v55, %v3609_v16  ;;  %v3618_v20 = vsub.f32 %v3570_v63, %v3609_v16  ;;  %v3619_v35 = vsub.f32 %v3572_v1, %v3609_v16 }
 0x5a4   :  { %v3612_v24 = vsub.f32 %v3610_v23, %v3611_v21 }
 0x5a5   :  { %v3644_v49 = vpop.permute.xlu1 %3643 }
 0x5a6   :  { %v3613_v25 = vmax.f32 %v3612_v24, 0.0 }
 0x5a7   :  { %v3632_v38 = vpop.permute.xlu0 %3631 }
 0x5a8   :  { %v3620_v26 = vadd.f32 1e-05, %v3613_v25 }
 0x5aa   :  { %4043 = vrsqrt.f32 %v3620_v26 }
 0x5b4   :  { %v4044_v32 = vpop.eup %4043 }
 0x5b5   :  { %v3622_v22 = vmul.f32 %v4044_v32, %v3614_v27  ;;  %v3623_v34 = vmul.f32 %v4044_v32, %v3615_v28  ;;  %v3624_v36 = vmul.f32 %v4044_v32, %v3616_v29  ;;  %v3625_v37 = vmul.f32 %v4044_v32, %v3617_v30 }
 0x5b6   :  { %v3626_v39 = vmul.f32 %v4044_v32, %v3618_v20  ;;  %v3627_v40 = vmul.f32 %v4044_v32, %v3619_v35 }
 0x5b7   :  { %v3634_v42 = vmul.f32 %v3632_v38, %v3622_v22  ;;  %v3635_v44 = vmul.f32 %v3632_v38, %v3623_v34  ;;  %v3636_v45 = vmul.f32 %v3632_v38, %v3624_v36  ;;  %v3637_v46 = vmul.f32 %v3632_v38, %v3625_v37 }
 0x5b8   :  { %v3638_v50 = vmul.f32 %v3632_v38, %v3626_v39  ;;  %v3639_v41 = vmul.f32 %v3632_v38, %v3627_v40 }
 0x5b9   :  { %v3646_v43 = vadd.f32 %v3644_v49, %v3634_v42  ;;  %v3647_v51 = vadd.f32 %v3644_v49, %v3635_v44  ;;  %v3648_v52 = vadd.f32 %v3644_v49, %v3636_v45  ;;  %v3649_v53 = vadd.f32 %v3644_v49, %v3637_v46 }
 0x5ba   :  { %v3650_v54 = vadd.f32 %v3644_v49, %v3638_v50  ;;  %v3651_v55 = vadd.f32 %v3644_v49, %v3639_v41 }
 0x5bb   :  { %v3652_v7 = vmax.f32 %v3646_v43, 0.0  ;;  %v3653_v4 = vmax.f32 %v3647_v51, 0.0  ;;  %v3654_v56 = vmax.f32 %v3648_v52, 0.0  ;;  %v3655_v57 = vmax.f32 %v3649_v53, 0.0 }
 0x5bc   :  { %v3656_v58 = vmax.f32 %v3650_v54, 0.0  ;;  %v3657_v59 = vmax.f32 %v3651_v55, 0.0 }
 0x5bd   :  { %v3658_v60 = vmul.f32 %v3652_v7, %v4445_v18  ;;  %v3659_v61 = vmul.f32 %v3653_v4, %v4447_v19  ;;  %v3660_v62 = vmul.f32 %v3654_v56, %v4459_v31  ;;  %v3661_v63 = vmul.f32 %v3655_v57, %v4461_v33 }
 0x5be   :  { %v3662_v0 = vmul.f32 %v3656_v58, %v4467_v47  ;;  %v3663_v1 = vmul.f32 %v3657_v59, %v4469_v48 }
 0x5bf   :  { %3664 = vst [vmem:[%s4797_s8] sm:$0xff] %v3658_v60  ;;  %3665 = vst [vmem:[%s4797_s8 + $0x8] sm:$0xff] %v3659_v61 }
 0x5c0   :  { %3666 = vst [vmem:[%s4797_s8 + $0x10] sm:$0xff] %v3660_v62  ;;  %3667 = vst [vmem:[%s4797_s8 + $0x18] sm:$0xff] %v3661_v63 }
 0x5c1   :  { %3668 = vst [vmem:[%s4797_s8 + $0x20] sm:$0xff] %v3662_v0  ;;  %3669 = vst [vmem:[%s4797_s8 + $0x28] sm:$0xff] %v3663_v1 }

</bundles_post_ra>
